<compile_context>
chip_gen: v5e
topology: v5e:2x2
jax: 0.10.0
libtpu: 0.0.40
codegen_flags: <defaults>
</compile_context>

<pallas_src>
import jax
import jax.numpy as jnp
from jax.experimental import pallas as pl
from jax.experimental.pallas import tpu as pltpu


# Layer sizes: 784 -> 128 -> 64 -> 12 -> 3 -> 12 -> 64 -> 128 -> 784
_DIMS = [28 * 28, 128, 64, 12, 3, 12, 64, 128, 28 * 28]
_D_IN = _DIMS[0]
_D_OUT = _DIMS[-1]


def _ae_kernel(x_ref,
               w1, b1, w2, b2, w3, b3, w45, b45,   # encoder (+ fused latent pair)
               w6, b6, w7, b7, w8, b8,             # decoder
               o_ref):
    """Fused 7-matmul autoencoder forward on one (TB, 784) batch tile."""
    # No-op if the caller already supplies bf16 activations.
    h = x_ref[...].astype(jnp.bfloat16)

    def _linear_relu(h, w_ref, b_ref):
        a = jnp.dot(h, w_ref[...], preferred_element_type=jnp.float32) + b_ref[...]
        return jnp.maximum(a, 0.0).astype(jnp.bfloat16)

    h = _linear_relu(h, w1, b1)      # 784 -> 128
    h = _linear_relu(h, w2, b2)      # 128 -> 64
    h = _linear_relu(h, w3, b3)      # 64  -> 12
    h = _linear_relu(h, w45, b45)    # 12 -> (3) -> 12 fused; no act on the latent
    h = _linear_relu(h, w6, b6)      # 12  -> 64
    h = _linear_relu(h, w7, b7)      # 64  -> 128
    out = jnp.tanh(jnp.dot(h, w8[...], preferred_element_type=jnp.float32) + b8[...])
    o_ref[...] = out.astype(o_ref.dtype)   # 128 -> 784 (masked vst on the 16-lane tail)


def init_params(key):
    """PyTorch-style init U(-1/sqrt(fan_in), 1/sqrt(fan_in)).

    Weights stored as (in_features, out_features); biases as (1, out_features).
    """
    params = []
    for i in range(len(_DIMS) - 1):
        d_in, d_out = _DIMS[i], _DIMS[i + 1]
        key, kw, kb = jax.random.split(key, 3)
        bound = 1.0 / jnp.sqrt(jnp.float32(d_in))
        w = jax.random.uniform(kw, (d_in, d_out), jnp.float32, -bound, bound)
        b = jax.random.uniform(kb, (1, d_out), jnp.float32, -bound, bound)
        params.append((w, b))
    return params


def prepare_params(params):
    """Host-side param prep: fuse the activation-free latent pair and cast
    weights to bf16 (biases stay f32).  No feature-dim padding.

    Returns [w1, b1, w2, b2, w3, b3, w45, b45, w6, b6, w7, b7, w8, b8].
    """
    ws = [w for w, _ in params]
    bs = [b for _, b in params]

    # Fuse Linear(12,3) -> Linear(3,12): there is no activation between them
    # in the original module, so (hW4+b4)W5+b5 == h(W4W5) + (b4W5+b5).
    w45 = ws[3] @ ws[4]            # (12, 12)
    b45 = bs[3] @ ws[4] + bs[4]    # (1, 12)

    fused_ws = [ws[0], ws[1], ws[2], w45, ws[5], ws[6], ws[7]]
    fused_bs = [bs[0], bs[1], bs[2], b45, bs[5], bs[6], bs[7]]

    flat = []
    for w, b in zip(fused_ws, fused_bs):
        flat.append(w.astype(jnp.bfloat16))   # bf16 weights: half the weight bytes
        flat.append(b.astype(jnp.float32))    # f32 biases / accumulation
    return flat


def _round_up(n, m):
    return -(-n // m) * m


def _choose_tb(batch, block_b):
    """Pick the batch-tile size (multiple of the 8-row sublane granule)."""
    b8 = _round_up(batch, 8)
    if b8 > block_b:
        return block_b
    # Whole batch would fit in one tile: split large-enough batches into two
    # tiles so the "parallel" grid axis can shard across both v7x TensorCores
    # (harmless ~0.35us extra step on v5e/v6e).  Tiny demo batches stay single.
    if b8 >= 32:
        return _round_up(-(-batch // 2), 8)
    return b8


def autoencoder_forward(x, prepared, *, block_b=512, out_dtype=jnp.float32):
    """x: (B, 784) float32 or bfloat16 -> (B, 784) `out_dtype`.

    block_b=512 keeps double-buffered f32 I/O blocks ~7 MiB (under v5e's
    16 MiB scoped VMEM); raise toward 1024 on v6e/v7x (with vmem_limit_bytes)
    for very large batches.  out_dtype=bfloat16 halves writeback traffic
    (tanh output is in [-1, 1]) at ~3-decimal-digit precision.
    """
    batch, d_in = x.shape
    assert d_in == _D_IN

    tb = _choose_tb(batch, block_b)
    n_tiles = pl.cdiv(batch, tb)
    bp = n_tiles * tb

    # Only the batch remainder is padded; the feature dim stays at 784.
    xp = x if bp == batch else jnp.pad(x, ((0, bp - batch), (0, 0)))

    out_dtype = jnp.dtype(out_dtype)
    flops = 2 * bp * sum(int(w.shape[0]) * int(w.shape[1]) for w in prepared[0::2])
    bytes_accessed = (bp * d_in * x.dtype.itemsize
                      + bp * _D_OUT * out_dtype.itemsize
                      + sum(int(t.size) * t.dtype.itemsize for t in prepared))
    cost = pl.CostEstimate(flops=flops,
                           transcendentals=bp * _D_OUT,        # tanh
                           bytes_accessed=bytes_accessed)

    def _call(single_buffer_weights):
        in_specs = [pl.BlockSpec((tb, d_in), lambda i: (i, 0))]
        for t in prepared:
            # Full-array blocks + constant index_map: DMA'd once, VMEM-resident
            # across all batch tiles.  Single-buffered when supported (never
            # re-fetched, so a second buffer is dead weight).
            if single_buffer_weights:
                spec = pl.BlockSpec(t.shape, lambda i: (0, 0),
                                    pipeline_mode=pl.Buffered(1))
            else:
                spec = pl.BlockSpec(t.shape, lambda i: (0, 0))
            in_specs.append(spec)
        return pl.pallas_call(
            _ae_kernel,
            out_shape=jax.ShapeDtypeStruct((bp, _D_OUT), out_dtype),
            grid=(n_tiles,),
            in_specs=in_specs,
            out_specs=pl.BlockSpec((tb, _D_OUT), lambda i: (i, 0)),
            compiler_params=pltpu.CompilerParams(
                # Batch tiles are independent -> shard across both TCs on v7x.
                dimension_semantics=("parallel",),
            ),
            cost_estimate=cost,
        )(xp, *prepared)

    try:
        out = _call(True)
    except Exception:
        # pl.Buffered(1) / pipeline_mode unsupported on this JAX build: fall
        # back to default double-buffered weight specs (validated path).
        out = _call(False)

    return out if bp == batch else out[:batch]


# ----------------------------- references -----------------------------------

def _reference_forward_f32(x, params):
    """Exact f32 semantics of the PyTorch module."""
    h = x.astype(jnp.float32)
    for i, (w, b) in enumerate(params):
        h = h @ w + b
        if i in (0, 1, 2, 4, 5, 6):   # ReLU after every hidden layer except latent
            h = jnp.maximum(h, 0.0)
        elif i == 7:                   # Tanh on the output
            h = jnp.tanh(h)
    return h


def _reference_forward_prepared(x, prepared):
    """Pure-JAX mirror of the kernel's bf16 path (tight correctness check)."""
    h = x.astype(jnp.bfloat16)
    pairs = list(zip(prepared[0::2], prepared[1::2]))
    for i, (w, b) in enumerate(pairs):
        a = jnp.dot(h, w, preferred_element_type=jnp.float32) + b
        if i < len(pairs) - 1:
            h = jnp.maximum(a, 0.0).astype(jnp.bfloat16)
        else:
            h = jnp.tanh(a)
    return h


if __name__ == "__main__":
    key = jax.random.PRNGKey(0)
    key, kx, kx2 = jax.random.split(key, 3)

    params = init_params(key)
    prepared = prepare_params(params)

    # 1) Small demo batch, f32 I/O (PyTorch semantics), single tile, no padding.
    B = 8
    x = jax.random.normal(kx, (B, _D_IN), jnp.float32)
    out = jax.block_until_ready(autoencoder_forward(x, prepared))
    assert out.shape == (B, _D_OUT) and out.dtype == jnp.float32
    assert jnp.allclose(out, _reference_forward_prepared(x, prepared), atol=2e-3), \
        "mismatch vs bf16-path reference"
    assert jnp.allclose(out, _reference_forward_f32(x, params), atol=5e-2), \
        "mismatch vs f32 reference"

    # 2) Batch-tiled grid with a batch remainder (136 rows -> 3 tiles of 64).
    B2 = 136
    x2 = jax.random.normal(kx2, (B2, _D_IN), jnp.float32)
    out2 = jax.block_until_ready(autoencoder_forward(x2, prepared, block_b=64))
    assert out2.shape == (B2, _D_OUT)
    assert jnp.allclose(out2, _reference_forward_prepared(x2, prepared), atol=2e-3), \
        "mismatch vs bf16-path reference (tiled)"

    # 3) bf16-in / bf16-out fast path (the cast stands in for an upstream
    #    producer that already emits bf16; exercises the 2-tile v7x split).
    x_bf16 = x2.astype(jnp.bfloat16)
    out3 = jax.block_until_ready(
        autoencoder_forward(x_bf16, prepared, out_dtype=jnp.bfloat16))
    assert out3.shape == (B2, _D_OUT) and out3.dtype == jnp.bfloat16
    assert jnp.allclose(out3.astype(jnp.float32),
                        _reference_forward_prepared(x_bf16, prepared), atol=8e-3), \
        "mismatch vs bf16-path reference (bf16 I/O)"

    print("KERNEL_OK")
</pallas_src>

<mosaic_0001>
module attributes {stable_mosaic.version = 11 : i64} {
  func.func @_ae_kernel(%arg0: i32, %arg1: memref<8x784xf32, #tpu.memory_space<vmem>>, %arg2: memref<784x128xbf16, #tpu.memory_space<vmem>>, %arg3: memref<1x128xf32, #tpu.memory_space<vmem>>, %arg4: memref<128x64xbf16, #tpu.memory_space<vmem>>, %arg5: memref<1x64xf32, #tpu.memory_space<vmem>>, %arg6: memref<64x12xbf16, #tpu.memory_space<vmem>>, %arg7: memref<1x12xf32, #tpu.memory_space<vmem>>, %arg8: memref<12x12xbf16, #tpu.memory_space<vmem>>, %arg9: memref<1x12xf32, #tpu.memory_space<vmem>>, %arg10: memref<12x64xbf16, #tpu.memory_space<vmem>>, %arg11: memref<1x64xf32, #tpu.memory_space<vmem>>, %arg12: memref<64x128xbf16, #tpu.memory_space<vmem>>, %arg13: memref<1x128xf32, #tpu.memory_space<vmem>>, %arg14: memref<128x784xbf16, #tpu.memory_space<vmem>>, %arg15: memref<1x784xf32, #tpu.memory_space<vmem>>, %arg16: memref<8x784xf32, #tpu.memory_space<vmem>>) attributes {dimension_semantics = [#tpu.dimension_semantics<parallel>], iteration_bounds = array<i64: 1>, scalar_prefetch = 0 : i64, scratch_operands = 0 : i64, tpu.core_type = #tpu.core_type<tc>, window_params = [{transform_indices = @transform_0, window_bounds = array<i64: 8, 784>}, {pipeline_mode = #tpu.pipeline_mode<synchronous>, transform_indices = @transform_1, window_bounds = array<i64: 784, 128>}, {pipeline_mode = #tpu.pipeline_mode<synchronous>, transform_indices = @transform_2, window_bounds = array<i64: 1, 128>}, {pipeline_mode = #tpu.pipeline_mode<synchronous>, transform_indices = @transform_3, window_bounds = array<i64: 128, 64>}, {pipeline_mode = #tpu.pipeline_mode<synchronous>, transform_indices = @transform_4, window_bounds = array<i64: 1, 64>}, {pipeline_mode = #tpu.pipeline_mode<synchronous>, transform_indices = @transform_5, window_bounds = array<i64: 64, 12>}, {pipeline_mode = #tpu.pipeline_mode<synchronous>, transform_indices = @transform_6, window_bounds = array<i64: 1, 12>}, {pipeline_mode = #tpu.pipeline_mode<synchronous>, transform_indices = @transform_7, window_bounds = array<i64: 12, 12>}, {pipeline_mode = #tpu.pipeline_mode<synchronous>, transform_indices = @transform_8, window_bounds = array<i64: 1, 12>}, {pipeline_mode = #tpu.pipeline_mode<synchronous>, transform_indices = @transform_9, window_bounds = array<i64: 12, 64>}, {pipeline_mode = #tpu.pipeline_mode<synchronous>, transform_indices = @transform_10, window_bounds = array<i64: 1, 64>}, {pipeline_mode = #tpu.pipeline_mode<synchronous>, transform_indices = @transform_11, window_bounds = array<i64: 64, 128>}, {pipeline_mode = #tpu.pipeline_mode<synchronous>, transform_indices = @transform_12, window_bounds = array<i64: 1, 128>}, {pipeline_mode = #tpu.pipeline_mode<synchronous>, transform_indices = @transform_13, window_bounds = array<i64: 128, 784>}, {pipeline_mode = #tpu.pipeline_mode<synchronous>, transform_indices = @transform_14, window_bounds = array<i64: 1, 784>}, {transform_indices = @transform_15, window_bounds = array<i64: 8, 784>}]} {
    %c0 = arith.constant 0 : index
    %c0_0 = arith.constant 0 : index
    %0 = vector.load %arg1[%c0, %c0_0] : memref<8x784xf32, #tpu.memory_space<vmem>>, vector<8x784xf32>
    %1 = arith.truncf %0 : vector<8x784xf32> to vector<8x784xbf16>
    %c0_1 = arith.constant 0 : index
    %c0_2 = arith.constant 0 : index
    %2 = vector.load %arg2[%c0_1, %c0_2] : memref<784x128xbf16, #tpu.memory_space<vmem>>, vector<784x128xbf16>
    %cst = arith.constant dense<0.000000e+00> : vector<8x128xf32>
    %3 = tpu.matmul %1, %2, %cst {dimension_numbers = #tpu.dot_dimension_numbers<[1], [0], [0], [1], [0, 0, 1, 1], [], []>} : vector<8x784xbf16>, vector<784x128xbf16>, vector<8x128xf32> -> vector<8x128xf32>
    %c0_3 = arith.constant 0 : index
    %c0_4 = arith.constant 0 : index
    %4 = vector.load %arg3[%c0_3, %c0_4] : memref<1x128xf32, #tpu.memory_space<vmem>>, vector<1x128xf32>
    %5 = vector.broadcast %4 : vector<1x128xf32> to vector<8x128xf32>
    %6 = arith.addf %3, %5 : vector<8x128xf32>
    %cst_5 = arith.constant 0.000000e+00 : f32
    %7 = vector.broadcast %cst_5 : f32 to vector<8x128xf32>
    %8 = arith.maximumf %6, %7 : vector<8x128xf32>
    %9 = arith.truncf %8 : vector<8x128xf32> to vector<8x128xbf16>
    %c0_6 = arith.constant 0 : index
    %c0_7 = arith.constant 0 : index
    %10 = vector.load %arg4[%c0_6, %c0_7] : memref<128x64xbf16, #tpu.memory_space<vmem>>, vector<128x64xbf16>
    %cst_8 = arith.constant dense<0.000000e+00> : vector<8x64xf32>
    %11 = tpu.matmul %9, %10, %cst_8 {dimension_numbers = #tpu.dot_dimension_numbers<[1], [0], [0], [1], [0, 0, 1, 1], [], []>} : vector<8x128xbf16>, vector<128x64xbf16>, vector<8x64xf32> -> vector<8x64xf32>
    %c0_9 = arith.constant 0 : index
    %c0_10 = arith.constant 0 : index
    %12 = vector.load %arg5[%c0_9, %c0_10] : memref<1x64xf32, #tpu.memory_space<vmem>>, vector<1x64xf32>
    %13 = vector.broadcast %12 : vector<1x64xf32> to vector<8x64xf32>
    %14 = arith.addf %11, %13 : vector<8x64xf32>
    %cst_11 = arith.constant 0.000000e+00 : f32
    %15 = vector.broadcast %cst_11 : f32 to vector<8x64xf32>
    %16 = arith.maximumf %14, %15 : vector<8x64xf32>
    %17 = arith.truncf %16 : vector<8x64xf32> to vector<8x64xbf16>
    %c0_12 = arith.constant 0 : index
    %c0_13 = arith.constant 0 : index
    %18 = vector.load %arg6[%c0_12, %c0_13] : memref<64x12xbf16, #tpu.memory_space<vmem>>, vector<64x12xbf16>
    %cst_14 = arith.constant dense<0.000000e+00> : vector<8x12xf32>
    %19 = tpu.matmul %17, %18, %cst_14 {dimension_numbers = #tpu.dot_dimension_numbers<[1], [0], [0], [1], [0, 0, 1, 1], [], []>} : vector<8x64xbf16>, vector<64x12xbf16>, vector<8x12xf32> -> vector<8x12xf32>
    %c0_15 = arith.constant 0 : index
    %c0_16 = arith.constant 0 : index
    %20 = vector.load %arg7[%c0_15, %c0_16] : memref<1x12xf32, #tpu.memory_space<vmem>>, vector<1x12xf32>
    %21 = vector.broadcast %20 : vector<1x12xf32> to vector<8x12xf32>
    %22 = arith.addf %19, %21 : vector<8x12xf32>
    %cst_17 = arith.constant 0.000000e+00 : f32
    %23 = vector.broadcast %cst_17 : f32 to vector<8x12xf32>
    %24 = arith.maximumf %22, %23 : vector<8x12xf32>
    %25 = arith.truncf %24 : vector<8x12xf32> to vector<8x12xbf16>
    %c0_18 = arith.constant 0 : index
    %c0_19 = arith.constant 0 : index
    %26 = vector.load %arg8[%c0_18, %c0_19] : memref<12x12xbf16, #tpu.memory_space<vmem>>, vector<12x12xbf16>
    %cst_20 = arith.constant dense<0.000000e+00> : vector<8x12xf32>
    %27 = tpu.matmul %25, %26, %cst_20 {dimension_numbers = #tpu.dot_dimension_numbers<[1], [0], [0], [1], [0, 0, 1, 1], [], []>} : vector<8x12xbf16>, vector<12x12xbf16>, vector<8x12xf32> -> vector<8x12xf32>
    %c0_21 = arith.constant 0 : index
    %c0_22 = arith.constant 0 : index
    %28 = vector.load %arg9[%c0_21, %c0_22] : memref<1x12xf32, #tpu.memory_space<vmem>>, vector<1x12xf32>
    %29 = vector.broadcast %28 : vector<1x12xf32> to vector<8x12xf32>
    %30 = arith.addf %27, %29 : vector<8x12xf32>
    %cst_23 = arith.constant 0.000000e+00 : f32
    %31 = vector.broadcast %cst_23 : f32 to vector<8x12xf32>
    %32 = arith.maximumf %30, %31 : vector<8x12xf32>
    %33 = arith.truncf %32 : vector<8x12xf32> to vector<8x12xbf16>
    %c0_24 = arith.constant 0 : index
    %c0_25 = arith.constant 0 : index
    %34 = vector.load %arg10[%c0_24, %c0_25] : memref<12x64xbf16, #tpu.memory_space<vmem>>, vector<12x64xbf16>
    %cst_26 = arith.constant dense<0.000000e+00> : vector<8x64xf32>
    %35 = tpu.matmul %33, %34, %cst_26 {dimension_numbers = #tpu.dot_dimension_numbers<[1], [0], [0], [1], [0, 0, 1, 1], [], []>} : vector<8x12xbf16>, vector<12x64xbf16>, vector<8x64xf32> -> vector<8x64xf32>
    %c0_27 = arith.constant 0 : index
    %c0_28 = arith.constant 0 : index
    %36 = vector.load %arg11[%c0_27, %c0_28] : memref<1x64xf32, #tpu.memory_space<vmem>>, vector<1x64xf32>
    %37 = vector.broadcast %36 : vector<1x64xf32> to vector<8x64xf32>
    %38 = arith.addf %35, %37 : vector<8x64xf32>
    %cst_29 = arith.constant 0.000000e+00 : f32
    %39 = vector.broadcast %cst_29 : f32 to vector<8x64xf32>
    %40 = arith.maximumf %38, %39 : vector<8x64xf32>
    %41 = arith.truncf %40 : vector<8x64xf32> to vector<8x64xbf16>
    %c0_30 = arith.constant 0 : index
    %c0_31 = arith.constant 0 : index
    %42 = vector.load %arg12[%c0_30, %c0_31] : memref<64x128xbf16, #tpu.memory_space<vmem>>, vector<64x128xbf16>
    %cst_32 = arith.constant dense<0.000000e+00> : vector<8x128xf32>
    %43 = tpu.matmul %41, %42, %cst_32 {dimension_numbers = #tpu.dot_dimension_numbers<[1], [0], [0], [1], [0, 0, 1, 1], [], []>} : vector<8x64xbf16>, vector<64x128xbf16>, vector<8x128xf32> -> vector<8x128xf32>
    %c0_33 = arith.constant 0 : index
    %c0_34 = arith.constant 0 : index
    %44 = vector.load %arg13[%c0_33, %c0_34] : memref<1x128xf32, #tpu.memory_space<vmem>>, vector<1x128xf32>
    %45 = vector.broadcast %44 : vector<1x128xf32> to vector<8x128xf32>
    %46 = arith.addf %43, %45 : vector<8x128xf32>
    %cst_35 = arith.constant 0.000000e+00 : f32
    %47 = vector.broadcast %cst_35 : f32 to vector<8x128xf32>
    %48 = arith.maximumf %46, %47 : vector<8x128xf32>
    %49 = arith.truncf %48 : vector<8x128xf32> to vector<8x128xbf16>
    %c0_36 = arith.constant 0 : index
    %c0_37 = arith.constant 0 : index
    %50 = vector.load %arg14[%c0_36, %c0_37] : memref<128x784xbf16, #tpu.memory_space<vmem>>, vector<128x784xbf16>
    %cst_38 = arith.constant dense<0.000000e+00> : vector<8x784xf32>
    %51 = tpu.matmul %49, %50, %cst_38 {dimension_numbers = #tpu.dot_dimension_numbers<[1], [0], [0], [1], [0, 0, 1, 1], [], []>} : vector<8x128xbf16>, vector<128x784xbf16>, vector<8x784xf32> -> vector<8x784xf32>
    %c0_39 = arith.constant 0 : index
    %c0_40 = arith.constant 0 : index
    %52 = vector.load %arg15[%c0_39, %c0_40] : memref<1x784xf32, #tpu.memory_space<vmem>>, vector<1x784xf32>
    %53 = vector.broadcast %52 : vector<1x784xf32> to vector<8x784xf32>
    %54 = arith.addf %51, %53 : vector<8x784xf32>
    %55 = math.tanh %54 : vector<8x784xf32>
    %c0_41 = arith.constant 0 : index
    %c0_42 = arith.constant 0 : index
    %56 = vector.load %arg16[%c0_41, %c0_42] : memref<8x784xf32, #tpu.memory_space<vmem>>, vector<8x784xf32>
    tpu.vector_store %arg16[%c0_41, %c0_42], %55 {strides = array<i32>} : memref<8x784xf32, #tpu.memory_space<vmem>>, vector<8x784xf32>,
    return
  }
  func.func @transform_0(%arg0: i32) -> (i32, i32) {
    %c0_i32 = arith.constant 0 : i32
    %c0_i32_0 = arith.constant 0 : i32
    return %arg0, %c0_i32 : i32, i32
  }
  func.func @transform_1(%arg0: i32) -> (i32, i32) {
    %c0_i32 = arith.constant 0 : i32
    %c0_i32_0 = arith.constant 0 : i32
    %c0_i32_1 = arith.constant 0 : i32
    return %c0_i32, %c0_i32_0 : i32, i32
  }
  func.func @transform_2(%arg0: i32) -> (i32, i32) {
    %c0_i32 = arith.constant 0 : i32
    %c0_i32_0 = arith.constant 0 : i32
    %c0_i32_1 = arith.constant 0 : i32
    return %c0_i32, %c0_i32_0 : i32, i32
  }
  func.func @transform_3(%arg0: i32) -> (i32, i32) {
    %c0_i32 = arith.constant 0 : i32
    %c0_i32_0 = arith.constant 0 : i32
    %c0_i32_1 = arith.constant 0 : i32
    return %c0_i32, %c0_i32_0 : i32, i32
  }
  func.func @transform_4(%arg0: i32) -> (i32, i32) {
    %c0_i32 = arith.constant 0 : i32
    %c0_i32_0 = arith.constant 0 : i32
    %c0_i32_1 = arith.constant 0 : i32
    return %c0_i32, %c0_i32_0 : i32, i32
  }
  func.func @transform_5(%arg0: i32) -> (i32, i32) {
    %c0_i32 = arith.constant 0 : i32
    %c0_i32_0 = arith.constant 0 : i32
    %c0_i32_1 = arith.constant 0 : i32
    return %c0_i32, %c0_i32_0 : i32, i32
  }
  func.func @transform_6(%arg0: i32) -> (i32, i32) {
    %c0_i32 = arith.constant 0 : i32
    %c0_i32_0 = arith.constant 0 : i32
    %c0_i32_1 = arith.constant 0 : i32
    return %c0_i32, %c0_i32_0 : i32, i32
  }
  func.func @transform_7(%arg0: i32) -> (i32, i32) {
    %c0_i32 = arith.constant 0 : i32
    %c0_i32_0 = arith.constant 0 : i32
    %c0_i32_1 = arith.constant 0 : i32
    return %c0_i32, %c0_i32_0 : i32, i32
  }
  func.func @transform_8(%arg0: i32) -> (i32, i32) {
    %c0_i32 = arith.constant 0 : i32
    %c0_i32_0 = arith.constant 0 : i32
    %c0_i32_1 = arith.constant 0 : i32
    return %c0_i32, %c0_i32_0 : i32, i32
  }
  func.func @transform_9(%arg0: i32) -> (i32, i32) {
    %c0_i32 = arith.constant 0 : i32
    %c0_i32_0 = arith.constant 0 : i32
    %c0_i32_1 = arith.constant 0 : i32
    return %c0_i32, %c0_i32_0 : i32, i32
  }
  func.func @transform_10(%arg0: i32) -> (i32, i32) {
    %c0_i32 = arith.constant 0 : i32
    %c0_i32_0 = arith.constant 0 : i32
    %c0_i32_1 = arith.constant 0 : i32
    return %c0_i32, %c0_i32_0 : i32, i32
  }
  func.func @transform_11(%arg0: i32) -> (i32, i32) {
    %c0_i32 = arith.constant 0 : i32
    %c0_i32_0 = arith.constant 0 : i32
    %c0_i32_1 = arith.constant 0 : i32
    return %c0_i32, %c0_i32_0 : i32, i32
  }
  func.func @transform_12(%arg0: i32) -> (i32, i32) {
    %c0_i32 = arith.constant 0 : i32
    %c0_i32_0 = arith.constant 0 : i32
    %c0_i32_1 = arith.constant 0 : i32
    return %c0_i32, %c0_i32_0 : i32, i32
  }
  func.func @transform_13(%arg0: i32) -> (i32, i32) {
    %c0_i32 = arith.constant 0 : i32
    %c0_i32_0 = arith.constant 0 : i32
    %c0_i32_1 = arith.constant 0 : i32
    return %c0_i32, %c0_i32_0 : i32, i32
  }
  func.func @transform_14(%arg0: i32) -> (i32, i32) {
    %c0_i32 = arith.constant 0 : i32
    %c0_i32_0 = arith.constant 0 : i32
    %c0_i32_1 = arith.constant 0 : i32
    return %c0_i32, %c0_i32_0 : i32, i32
  }
  func.func @transform_15(%arg0: i32) -> (i32, i32) {
    %c0_i32 = arith.constant 0 : i32
    %c0_i32_0 = arith.constant 0 : i32
    return %arg0, %c0_i32 : i32, i32
  }
}

module attributes {stable_mosaic.version = 11 : i64} {
  func.func @_ae_kernel(%arg0: i32, %arg1: memref<8x784xf32, #tpu.memory_space<vmem>>, %arg2: memref<784x128xbf16, #tpu.memory_space<vmem>>, %arg3: memref<1x128xf32, #tpu.memory_space<vmem>>, %arg4: memref<128x64xbf16, #tpu.memory_space<vmem>>, %arg5: memref<1x64xf32, #tpu.memory_space<vmem>>, %arg6: memref<64x12xbf16, #tpu.memory_space<vmem>>, %arg7: memref<1x12xf32, #tpu.memory_space<vmem>>, %arg8: memref<12x12xbf16, #tpu.memory_space<vmem>>, %arg9: memref<1x12xf32, #tpu.memory_space<vmem>>, %arg10: memref<12x64xbf16, #tpu.memory_space<vmem>>, %arg11: memref<1x64xf32, #tpu.memory_space<vmem>>, %arg12: memref<64x128xbf16, #tpu.memory_space<vmem>>, %arg13: memref<1x128xf32, #tpu.memory_space<vmem>>, %arg14: memref<128x784xbf16, #tpu.memory_space<vmem>>, %arg15: memref<1x784xf32, #tpu.memory_space<vmem>>, %arg16: memref<8x784xf32, #tpu.memory_space<vmem>>) attributes {dimension_semantics = [#tpu.dimension_semantics<parallel>], iteration_bounds = array<i64: 1>, scalar_prefetch = 0 : i64, scratch_operands = 0 : i64, tpu.core_type = #tpu.core_type<tc>, window_params = [{transform_indices = @transform_0, window_bounds = array<i64: 8, 784>}, {pipeline_mode = #tpu.pipeline_mode<synchronous>, transform_indices = @transform_1, window_bounds = array<i64: 784, 128>}, {pipeline_mode = #tpu.pipeline_mode<synchronous>, transform_indices = @transform_2, window_bounds = array<i64: 1, 128>}, {pipeline_mode = #tpu.pipeline_mode<synchronous>, transform_indices = @transform_3, window_bounds = array<i64: 128, 64>}, {pipeline_mode = #tpu.pipeline_mode<synchronous>, transform_indices = @transform_4, window_bounds = array<i64: 1, 64>}, {pipeline_mode = #tpu.pipeline_mode<synchronous>, transform_indices = @transform_5, window_bounds = array<i64: 64, 12>}, {pipeline_mode = #tpu.pipeline_mode<synchronous>, transform_indices = @transform_6, window_bounds = array<i64: 1, 12>}, {pipeline_mode = #tpu.pipeline_mode<synchronous>, transform_indices = @transform_7, window_bounds = array<i64: 12, 12>}, {pipeline_mode = #tpu.pipeline_mode<synchronous>, transform_indices = @transform_8, window_bounds = array<i64: 1, 12>}, {pipeline_mode = #tpu.pipeline_mode<synchronous>, transform_indices = @transform_9, window_bounds = array<i64: 12, 64>}, {pipeline_mode = #tpu.pipeline_mode<synchronous>, transform_indices = @transform_10, window_bounds = array<i64: 1, 64>}, {pipeline_mode = #tpu.pipeline_mode<synchronous>, transform_indices = @transform_11, window_bounds = array<i64: 64, 128>}, {pipeline_mode = #tpu.pipeline_mode<synchronous>, transform_indices = @transform_12, window_bounds = array<i64: 1, 128>}, {pipeline_mode = #tpu.pipeline_mode<synchronous>, transform_indices = @transform_13, window_bounds = array<i64: 128, 784>}, {pipeline_mode = #tpu.pipeline_mode<synchronous>, transform_indices = @transform_14, window_bounds = array<i64: 1, 784>}, {transform_indices = @transform_15, window_bounds = array<i64: 8, 784>}]} {
    %c0 = arith.constant 0 : index
    %c0_0 = arith.constant 0 : index
    %0 = vector.load %arg1[%c0, %c0_0] : memref<8x784xf32, #tpu.memory_space<vmem>>, vector<8x784xf32>
    %1 = arith.truncf %0 : vector<8x784xf32> to vector<8x784xbf16>
    %c0_1 = arith.constant 0 : index
    %c0_2 = arith.constant 0 : index
    %2 = vector.load %arg2[%c0_1, %c0_2] : memref<784x128xbf16, #tpu.memory_space<vmem>>, vector<784x128xbf16>
    %cst = arith.constant dense<0.000000e+00> : vector<8x128xf32>
    %3 = tpu.matmul %1, %2, %cst {dimension_numbers = #tpu.dot_dimension_numbers<[1], [0], [0], [1], [0, 0, 1, 1], [], []>} : vector<8x784xbf16>, vector<784x128xbf16>, vector<8x128xf32> -> vector<8x128xf32>
    %c0_3 = arith.constant 0 : index
    %c0_4 = arith.constant 0 : index
    %4 = vector.load %arg3[%c0_3, %c0_4] : memref<1x128xf32, #tpu.memory_space<vmem>>, vector<1x128xf32>
    %5 = vector.broadcast %4 : vector<1x128xf32> to vector<8x128xf32>
    %6 = arith.addf %3, %5 : vector<8x128xf32>
    %cst_5 = arith.constant 0.000000e+00 : f32
    %7 = vector.broadcast %cst_5 : f32 to vector<8x128xf32>
    %8 = arith.maximumf %6, %7 : vector<8x128xf32>
    %9 = arith.truncf %8 : vector<8x128xf32> to vector<8x128xbf16>
    %c0_6 = arith.constant 0 : index
    %c0_7 = arith.constant 0 : index
    %10 = vector.load %arg4[%c0_6, %c0_7] : memref<128x64xbf16, #tpu.memory_space<vmem>>, vector<128x64xbf16>
    %cst_8 = arith.constant dense<0.000000e+00> : vector<8x64xf32>
    %11 = tpu.matmul %9, %10, %cst_8 {dimension_numbers = #tpu.dot_dimension_numbers<[1], [0], [0], [1], [0, 0, 1, 1], [], []>} : vector<8x128xbf16>, vector<128x64xbf16>, vector<8x64xf32> -> vector<8x64xf32>
    %c0_9 = arith.constant 0 : index
    %c0_10 = arith.constant 0 : index
    %12 = vector.load %arg5[%c0_9, %c0_10] : memref<1x64xf32, #tpu.memory_space<vmem>>, vector<1x64xf32>
    %13 = vector.broadcast %12 : vector<1x64xf32> to vector<8x64xf32>
    %14 = arith.addf %11, %13 : vector<8x64xf32>
    %cst_11 = arith.constant 0.000000e+00 : f32
    %15 = vector.broadcast %cst_11 : f32 to vector<8x64xf32>
    %16 = arith.maximumf %14, %15 : vector<8x64xf32>
    %17 = arith.truncf %16 : vector<8x64xf32> to vector<8x64xbf16>
    %c0_12 = arith.constant 0 : index
    %c0_13 = arith.constant 0 : index
    %18 = vector.load %arg6[%c0_12, %c0_13] : memref<64x12xbf16, #tpu.memory_space<vmem>>, vector<64x12xbf16>
    %cst_14 = arith.constant dense<0.000000e+00> : vector<8x12xf32>
    %19 = tpu.matmul %17, %18, %cst_14 {dimension_numbers = #tpu.dot_dimension_numbers<[1], [0], [0], [1], [0, 0, 1, 1], [], []>} : vector<8x64xbf16>, vector<64x12xbf16>, vector<8x12xf32> -> vector<8x12xf32>
    %c0_15 = arith.constant 0 : index
    %c0_16 = arith.constant 0 : index
    %20 = vector.load %arg7[%c0_15, %c0_16] : memref<1x12xf32, #tpu.memory_space<vmem>>, vector<1x12xf32>
    %21 = vector.broadcast %20 : vector<1x12xf32> to vector<8x12xf32>
    %22 = arith.addf %19, %21 : vector<8x12xf32>
    %cst_17 = arith.constant 0.000000e+00 : f32
    %23 = vector.broadcast %cst_17 : f32 to vector<8x12xf32>
    %24 = arith.maximumf %22, %23 : vector<8x12xf32>
    %25 = arith.truncf %24 : vector<8x12xf32> to vector<8x12xbf16>
    %c0_18 = arith.constant 0 : index
    %c0_19 = arith.constant 0 : index
    %26 = vector.load %arg8[%c0_18, %c0_19] : memref<12x12xbf16, #tpu.memory_space<vmem>>, vector<12x12xbf16>
    %cst_20 = arith.constant dense<0.000000e+00> : vector<8x12xf32>
    %27 = tpu.matmul %25, %26, %cst_20 {dimension_numbers = #tpu.dot_dimension_numbers<[1], [0], [0], [1], [0, 0, 1, 1], [], []>} : vector<8x12xbf16>, vector<12x12xbf16>, vector<8x12xf32> -> vector<8x12xf32>
    %c0_21 = arith.constant 0 : index
    %c0_22 = arith.constant 0 : index
    %28 = vector.load %arg9[%c0_21, %c0_22] : memref<1x12xf32, #tpu.memory_space<vmem>>, vector<1x12xf32>
    %29 = vector.broadcast %28 : vector<1x12xf32> to vector<8x12xf32>
    %30 = arith.addf %27, %29 : vector<8x12xf32>
    %cst_23 = arith.constant 0.000000e+00 : f32
    %31 = vector.broadcast %cst_23 : f32 to vector<8x12xf32>
    %32 = arith.maximumf %30, %31 : vector<8x12xf32>
    %33 = arith.truncf %32 : vector<8x12xf32> to vector<8x12xbf16>
    %c0_24 = arith.constant 0 : index
    %c0_25 = arith.constant 0 : index
    %34 = vector.load %arg10[%c0_24, %c0_25] : memref<12x64xbf16, #tpu.memory_space<vmem>>, vector<12x64xbf16>
    %cst_26 = arith.constant dense<0.000000e+00> : vector<8x64xf32>
    %35 = tpu.matmul %33, %34, %cst_26 {dimension_numbers = #tpu.dot_dimension_numbers<[1], [0], [0], [1], [0, 0, 1, 1], [], []>} : vector<8x12xbf16>, vector<12x64xbf16>, vector<8x64xf32> -> vector<8x64xf32>
    %c0_27 = arith.constant 0 : index
    %c0_28 = arith.constant 0 : index
    %36 = vector.load %arg11[%c0_27, %c0_28] : memref<1x64xf32, #tpu.memory_space<vmem>>, vector<1x64xf32>
    %37 = vector.broadcast %36 : vector<1x64xf32> to vector<8x64xf32>
    %38 = arith.addf %35, %37 : vector<8x64xf32>
    %cst_29 = arith.constant 0.000000e+00 : f32
    %39 = vector.broadcast %cst_29 : f32 to vector<8x64xf32>
    %40 = arith.maximumf %38, %39 : vector<8x64xf32>
    %41 = arith.truncf %40 : vector<8x64xf32> to vector<8x64xbf16>
    %c0_30 = arith.constant 0 : index
    %c0_31 = arith.constant 0 : index
    %42 = vector.load %arg12[%c0_30, %c0_31] : memref<64x128xbf16, #tpu.memory_space<vmem>>, vector<64x128xbf16>
    %cst_32 = arith.constant dense<0.000000e+00> : vector<8x128xf32>
    %43 = tpu.matmul %41, %42, %cst_32 {dimension_numbers = #tpu.dot_dimension_numbers<[1], [0], [0], [1], [0, 0, 1, 1], [], []>} : vector<8x64xbf16>, vector<64x128xbf16>, vector<8x128xf32> -> vector<8x128xf32>
    %c0_33 = arith.constant 0 : index
    %c0_34 = arith.constant 0 : index
    %44 = vector.load %arg13[%c0_33, %c0_34] : memref<1x128xf32, #tpu.memory_space<vmem>>, vector<1x128xf32>
    %45 = vector.broadcast %44 : vector<1x128xf32> to vector<8x128xf32>
    %46 = arith.addf %43, %45 : vector<8x128xf32>
    %cst_35 = arith.constant 0.000000e+00 : f32
    %47 = vector.broadcast %cst_35 : f32 to vector<8x128xf32>
    %48 = arith.maximumf %46, %47 : vector<8x128xf32>
    %49 = arith.truncf %48 : vector<8x128xf32> to vector<8x128xbf16>
    %c0_36 = arith.constant 0 : index
    %c0_37 = arith.constant 0 : index
    %50 = vector.load %arg14[%c0_36, %c0_37] : memref<128x784xbf16, #tpu.memory_space<vmem>>, vector<128x784xbf16>
    %cst_38 = arith.constant dense<0.000000e+00> : vector<8x784xf32>
    %51 = tpu.matmul %49, %50, %cst_38 {dimension_numbers = #tpu.dot_dimension_numbers<[1], [0], [0], [1], [0, 0, 1, 1], [], []>} : vector<8x128xbf16>, vector<128x784xbf16>, vector<8x784xf32> -> vector<8x784xf32>
    %c0_39 = arith.constant 0 : index
    %c0_40 = arith.constant 0 : index
    %52 = vector.load %arg15[%c0_39, %c0_40] : memref<1x784xf32, #tpu.memory_space<vmem>>, vector<1x784xf32>
    %53 = vector.broadcast %52 : vector<1x784xf32> to vector<8x784xf32>
    %54 = arith.addf %51, %53 : vector<8x784xf32>
    %55 = math.tanh %54 : vector<8x784xf32>
    %c0_41 = arith.constant 0 : index
    %c0_42 = arith.constant 0 : index
    %56 = vector.load %arg16[%c0_41, %c0_42] : memref<8x784xf32, #tpu.memory_space<vmem>>, vector<8x784xf32>
    tpu.vector_store %arg16[%c0_41, %c0_42], %55 {strides = array<i32>} : memref<8x784xf32, #tpu.memory_space<vmem>>, vector<8x784xf32>,
    return
  }
  func.func @transform_0(%arg0: i32) -> (i32, i32) {
    %c0_i32 = arith.constant 0 : i32
    %c0_i32_0 = arith.constant 0 : i32
    return %arg0, %c0_i32 : i32, i32
  }
  func.func @transform_1(%arg0: i32) -> (i32, i32) {
    %c0_i32 = arith.constant 0 : i32
    %c0_i32_0 = arith.constant 0 : i32
    %c0_i32_1 = arith.constant 0 : i32
    return %c0_i32, %c0_i32_0 : i32, i32
  }
  func.func @transform_2(%arg0: i32) -> (i32, i32) {
    %c0_i32 = arith.constant 0 : i32
    %c0_i32_0 = arith.constant 0 : i32
    %c0_i32_1 = arith.constant 0 : i32
    return %c0_i32, %c0_i32_0 : i32, i32
  }
  func.func @transform_3(%arg0: i32) -> (i32, i32) {
    %c0_i32 = arith.constant 0 : i32
    %c0_i32_0 = arith.constant 0 : i32
    %c0_i32_1 = arith.constant 0 : i32
    return %c0_i32, %c0_i32_0 : i32, i32
  }
  func.func @transform_4(%arg0: i32) -> (i32, i32) {
    %c0_i32 = arith.constant 0 : i32
    %c0_i32_0 = arith.constant 0 : i32
    %c0_i32_1 = arith.constant 0 : i32
    return %c0_i32, %c0_i32_0 : i32, i32
  }
  func.func @transform_5(%arg0: i32) -> (i32, i32) {
    %c0_i32 = arith.constant 0 : i32
    %c0_i32_0 = arith.constant 0 : i32
    %c0_i32_1 = arith.constant 0 : i32
    return %c0_i32, %c0_i32_0 : i32, i32
  }
  func.func @transform_6(%arg0: i32) -> (i32, i32) {
    %c0_i32 = arith.constant 0 : i32
    %c0_i32_0 = arith.constant 0 : i32
    %c0_i32_1 = arith.constant 0 : i32
    return %c0_i32, %c0_i32_0 : i32, i32
  }
  func.func @transform_7(%arg0: i32) -> (i32, i32) {
    %c0_i32 = arith.constant 0 : i32
    %c0_i32_0 = arith.constant 0 : i32
    %c0_i32_1 = arith.constant 0 : i32
    return %c0_i32, %c0_i32_0 : i32, i32
  }
  func.func @transform_8(%arg0: i32) -> (i32, i32) {
    %c0_i32 = arith.constant 0 : i32
    %c0_i32_0 = arith.constant 0 : i32
    %c0_i32_1 = arith.constant 0 : i32
    return %c0_i32, %c0_i32_0 : i32, i32
  }
  func.func @transform_9(%arg0: i32) -> (i32, i32) {
    %c0_i32 = arith.constant 0 : i32
    %c0_i32_0 = arith.constant 0 : i32
    %c0_i32_1 = arith.constant 0 : i32
    return %c0_i32, %c0_i32_0 : i32, i32
  }
  func.func @transform_10(%arg0: i32) -> (i32, i32) {
    %c0_i32 = arith.constant 0 : i32
    %c0_i32_0 = arith.constant 0 : i32
    %c0_i32_1 = arith.constant 0 : i32
    return %c0_i32, %c0_i32_0 : i32, i32
  }
  func.func @transform_11(%arg0: i32) -> (i32, i32) {
    %c0_i32 = arith.constant 0 : i32
    %c0_i32_0 = arith.constant 0 : i32
    %c0_i32_1 = arith.constant 0 : i32
    return %c0_i32, %c0_i32_0 : i32, i32
  }
  func.func @transform_12(%arg0: i32) -> (i32, i32) {
    %c0_i32 = arith.constant 0 : i32
    %c0_i32_0 = arith.constant 0 : i32
    %c0_i32_1 = arith.constant 0 : i32
    return %c0_i32, %c0_i32_0 : i32, i32
  }
  func.func @transform_13(%arg0: i32) -> (i32, i32) {
    %c0_i32 = arith.constant 0 : i32
    %c0_i32_0 = arith.constant 0 : i32
    %c0_i32_1 = arith.constant 0 : i32
    return %c0_i32, %c0_i32_0 : i32, i32
  }
  func.func @transform_14(%arg0: i32) -> (i32, i32) {
    %c0_i32 = arith.constant 0 : i32
    %c0_i32_0 = arith.constant 0 : i32
    %c0_i32_1 = arith.constant 0 : i32
    return %c0_i32, %c0_i32_0 : i32, i32
  }
  func.func @transform_15(%arg0: i32) -> (i32, i32) {
    %c0_i32 = arith.constant 0 : i32
    %c0_i32_0 = arith.constant 0 : i32
    return %arg0, %c0_i32 : i32, i32
  }
}

</mosaic_0001>

<bundles_post_ra>
// kernel: tpu_custom_call.1
= control target key start
LH: loop header
LB: loop body
LE: loop exit
PB: predicated region body
PF: predicated region fallthrough
CT: control target
= control target key end

     0   :  { %s2646_s0 = inlined_call_operand.vmem [shape: f32[8,784], index: 0, kind: input, shape index: {}]   ;;  %s2647_s1 = inlined_call_operand.vmem [shape: bf16[784,128], index: 1, kind: input, shape index: {}]   ;;  %s2648_s2 = inlined_call_operand.vmem [shape: f32[1,128], index: 2, kind: input, shape index: {}]   ;;  %s2649_s3 = inlined_call_operand.vmem [shape: bf16[128,64], index: 3, kind: input, shape index: {}]   ;;  %s2650_s4 = inlined_call_operand.vmem [shape: f32[1,64], index: 4, kind: input, shape index: {}]   ;;  %s2651_s5 = inlined_call_operand.vmem [shape: bf16[64,12], index: 5, kind: input, shape index: {}]   ;;  %s2652_s6 = inlined_call_operand.vmem [shape: f32[1,12], index: 6, kind: input, shape index: {}]   ;;  %s2653_s7 = inlined_call_operand.vmem [shape: bf16[12,12], index: 7, kind: input, shape index: {}]   ;;  %s2654_s8 = inlined_call_operand.vmem [shape: f32[1,12], index: 8, kind: input, shape index: {}]   ;;  %s2655_s9 = inlined_call_operand.vmem [shape: bf16[12,64], index: 9, kind: input, shape index: {}]   ;;  %s2656_s10 = inlined_call_operand.vmem [shape: f32[1,64], index: 10, kind: input, shape index: {}]   ;;  %s2657_s11 = inlined_call_operand.vmem [shape: bf16[64,128], index: 11, kind: input, shape index: {}]   ;;  %s2658_s12 = inlined_call_operand.vmem [shape: f32[1,128], index: 12, kind: input, shape index: {}]   ;;  %s2659_s13 = inlined_call_operand.vmem [shape: bf16[128,784], index: 13, kind: input, shape index: {}]   ;;  %s2660_s14 = inlined_call_operand.vmem [shape: f32[1,784], index: 14, kind: input, shape index: {}]   ;;  %s2661_s15 = inlined_call_operand.hbm [shape: f32[8,784], index: 15, kind: output, shape index: {}]  }
   0x1   :  { %v1810_v0 = vld [vmem:[%s2647_s1 + $0x38] sm:$0xff]  ;;  %v1809_v3 = vld [vmem:[%s2647_s1 + $0x30] sm:$0xff]  ;;  %v1808_v8 = vld [vmem:[%s2647_s1 + $0x28] sm:$0xff] }
   0x2   :  { %v1818_v1 = vld [vmem:[%s2647_s1 + $0x78] sm:$0xff]  ;;  %466 = vmatpush.bf16.msra.mxu0 %v1810_v0  ;;  %v1817_v4 = vld [vmem:[%s2647_s1 + $0x70] sm:$0xff]  ;;  %v1816_v9 = vld [vmem:[%s2647_s1 + $0x68] sm:$0xff] }
   0x3   :  { %v1826_v2 = vld [vmem:[%s2647_s1 + $0xb8] sm:$0xff]  ;;  %479 = vmatpush.bf16.msra.mxu1 %v1818_v1  ;;  %v1825_v5 = vld [vmem:[%s2647_s1 + $0xb0] sm:$0xff]  ;;  %v1824_v10 = vld [vmem:[%s2647_s1 + $0xa8] sm:$0xff] }
   0x4   :  { %492 = vmatpush.bf16.msra.mxu2 %v1826_v2  ;;  %v1834_v6 = vld [vmem:[%s2647_s1 + $0xf8] sm:$0xff]  ;;  %v1833_v7 = vld [vmem:[%s2647_s1 + $0xf0] sm:$0xff]  ;;  %v1832_v11 = vld [vmem:[%s2647_s1 + $0xe8] sm:$0xff] }
   0x5   :  { %505 = vmatpush.bf16.msra.mxu3 %v1834_v6  ;;  %v1807_v12 = vld [vmem:[%s2647_s1 + $0x20] sm:$0xff]  ;;  %v1806_v16 = vld [vmem:[%s2647_s1 + $0x18] sm:$0xff]  ;;  %v1805_v19 = vld [vmem:[%s2647_s1 + $0x10] sm:$0xff] }
   0x6   :  { %467 = vmatpush.bf16.msra.mxu0 %v1809_v3  ;;  %v1815_v13 = vld [vmem:[%s2647_s1 + $0x60] sm:$0xff]  ;;  %v1814_v17 = vld [vmem:[%s2647_s1 + $0x58] sm:$0xff]  ;;  %v1813_v20 = vld [vmem:[%s2647_s1 + $0x50] sm:$0xff] }
   0x7   :  { %480 = vmatpush.bf16.msra.mxu1 %v1817_v4  ;;  %v1823_v14 = vld [vmem:[%s2647_s1 + $0xa0] sm:$0xff]  ;;  %v1822_v18 = vld [vmem:[%s2647_s1 + $0x98] sm:$0xff] }
   0x8   :  { %493 = vmatpush.bf16.msra.mxu2 %v1825_v5  ;;  %v1831_v15 = vld [vmem:[%s2647_s1 + $0xe0] sm:$0xff]  ;;  %v1830_v21 = vld [vmem:[%s2647_s1 + $0xd8] sm:$0xff] }
   0x9   :  { %506 = vmatpush.bf16.msra.mxu3 %v1833_v7 }
   0xa   :  { %468 = vmatpush.bf16.msra.mxu0 %v1808_v8 }
   0xb   :  { %481 = vmatpush.bf16.msra.mxu1 %v1816_v9 }
   0xc   :  { %494 = vmatpush.bf16.msra.mxu2 %v1824_v10 }
   0xd   :  { %507 = vmatpush.bf16.msra.mxu3 %v1832_v11 }
   0xe   :  { %469 = vmatpush.bf16.msra.mxu0 %v1807_v12 }
   0xf   :  { %482 = vmatpush.bf16.msra.mxu1 %v1815_v13 }
  0x10   :  { %495 = vmatpush.bf16.msra.mxu2 %v1823_v14 }
  0x11   :  { %508 = vmatpush.bf16.msra.mxu3 %v1831_v15 }
  0x12   :  { %470 = vmatpush.bf16.msra.mxu0 %v1806_v16 }
  0x13   :  { %483 = vmatpush.bf16.msra.mxu1 %v1814_v17 }
  0x14   :  { %20 = vsyncpa [#allocation3], 0  ;;  %496 = vmatpush.bf16.msra.mxu2 %v1822_v18  ;;  %v1821_v22 = vld [vmem:[%s2647_s1 + $0x90] sm:$0xff]  ;;  %v1804_v24 = vld [vmem:[%s2647_s1 + $0x8] sm:$0xff]  ;;  %vm462_vm0 = vcmask 130048   ;;  %vm712_vm1 = vcmask 1045504  }
  0x15   :  { %509 = vmatpush.bf16.msra.mxu3 %v1830_v21  ;;  %v1829_v23 = vld [vmem:[%s2647_s1 + $0xd0] sm:$0xff]  ;;  %v1812_v25 = vld [vmem:[%s2647_s1 + $0x48] sm:$0xff]  ;;  %v1803_v27 = vld [vmem:[%s2647_s1] sm:$0xff]  ;;  %vm678_vm2 = vcmask 523264   ;;  %vm708_vm3 = vcmask 97280  }
  0x16   :  { %471 = vmatpush.bf16.msra.mxu0 %v1805_v19  ;;  %v1820_v26 = vld [vmem:[%s2647_s1 + $0x88] sm:$0xff]  ;;  %v1811_v29 = vld [vmem:[%s2647_s1 + $0x40] sm:$0xff]  ;;  %v1842_v32 = vld [vmem:[%s2647_s1 + $0x138] sm:$0xff] }
  0x17   :  { %484 = vmatpush.bf16.msra.mxu1 %v1813_v20  ;;  %v1828_v28 = vld [vmem:[%s2647_s1 + $0xc8] sm:$0xff]  ;;  %v52_v30 = vld [vmem:[%s2646_s0] sm:$0xff]  ;;  %v1850_v33 = vld [vmem:[%s2647_s1 + $0x178] sm:$0xff] }
  0x18   :  { %497 = vmatpush.bf16.msra.mxu2 %v1821_v22  ;;  %v53_v31 = vld [vmem:[%s2646_s0 + $0x8] sm:$0xff]  ;;  %v1819_v34 = vld [vmem:[%s2647_s1 + $0x80] sm:$0xff]  ;;  %v54_v35 = vld [vmem:[%s2646_s0 + $0x10] sm:$0xff]  ;;  %v59_v36 = vpack.c.bf16 %v52_v30, %v52_v30 }
  0x19   :  { %510 = vmatpush.bf16.msra.mxu3 %v1829_v23  ;;  %v60_v37 = vpack.c.bf16 %v53_v31, %v53_v31  ;;  %v1827_v38 = vld [vmem:[%s2647_s1 + $0xc0] sm:$0xff]  ;;  %v55_v40 = vld [vmem:[%s2646_s0 + $0x18] sm:$0xff]  ;;  %v1841_v41 = vld [vmem:[%s2647_s1 + $0x130] sm:$0xff]  ;;  %v61_v43 = vpack.c.bf16 %v54_v35, %v54_v35 }
  0x1a   :  { %472 = vmatpush.bf16.msra.mxu0 %v1804_v24  ;;  %v1851_v39 = vld [vmem:[%s2647_s1 + $0x180] sm:$0xff]  ;;  %v1849_v42 = vld [vmem:[%s2647_s1 + $0x170] sm:$0xff]  ;;  %v62_v44 = vpack.c.bf16 %v55_v40, %v55_v40  ;;  %v1840_v45 = vld [vmem:[%s2647_s1 + $0x128] sm:$0xff] }
  0x1b   :  { %485 = vmatpush.bf16.msra.mxu1 %v1812_v25  ;;  %v1848_v46 = vld [vmem:[%s2647_s1 + $0x168] sm:$0xff]  ;;  %v1839_v47 = vld [vmem:[%s2647_s1 + $0x120] sm:$0xff]  ;;  %v1838_v49 = vld [vmem:[%s2647_s1 + $0x118] sm:$0xff] }
  0x1c   :  { %498 = vmatpush.bf16.msra.mxu2 %v1820_v26  ;;  %v1847_v48 = vld [vmem:[%s2647_s1 + $0x160] sm:$0xff]  ;;  %v1846_v50 = vld [vmem:[%s2647_s1 + $0x158] sm:$0xff]  ;;  %v58_v51 = vld [vmem:[%s2646_s0 + $0x30] sm:$0xff] }
  0x1d   :  { %511 = vmatpush.bf16.msra.mxu3 %v1828_v28  ;;  %v1837_v52 = vld [vmem:[%s2647_s1 + $0x110] sm:$0xff]  ;;  %v65_v54 = vpack.c.bf16 %v58_v51, %v58_v51  ;;  %v1836_v55 = vld [vmem:[%s2647_s1 + $0x108] sm:$0xff]  ;;  %v1835_v57 = vld [vmem:[%s2647_s1 + $0x100] sm:$0xff] }
  0x1e   :  { %473 = vmatpush.bf16.msra.mxu0 %v1803_v27  ;;  %v1845_v53 = vld [vmem:[%s2647_s1 + $0x150] sm:$0xff]  ;;  %v1844_v56 = vld [vmem:[%s2647_s1 + $0x148] sm:$0xff]  ;;  %v1843_v58 = vld [vmem:[%s2647_s1 + $0x140] sm:$0xff] }
  0x1f   :  { %486 = vmatpush.bf16.msra.mxu1 %v1811_v29  ;;  %v56_v59 = vld [vmem:[%s2646_s0 + $0x20] sm:$0xff]  ;;  %v57_v60 = vld [vmem:[%s2646_s0 + $0x28] sm:$0xff]  ;;  %v1859_v63 = vld [vmem:[%s2649_s3 + $0x38] sm:$0xff] }
  0x20   :  { %499 = vmatpush.bf16.msra.mxu2 %v1819_v34  ;;  %v63_v61 = vpack.c.bf16 %v56_v59, %v56_v59  ;;  %v64_v62 = vpack.c.bf16 %v57_v60, %v57_v60  ;;  %v1858_v0 = vld [vmem:[%s2649_s3 + $0x30] sm:$0xff]  ;;  %v1857_v1 = vld [vmem:[%s2649_s3 + $0x28] sm:$0xff]  ;;  %v1856_v2 = vld [vmem:[%s2649_s3 + $0x20] sm:$0xff] }
  0x21   :  { %474 = vmatmul.bf16.vlgmr.msra.gmra.mxu0 %v59_v36  ;;  %512 = vmatpush.bf16.msra.mxu3 %v1827_v38  ;;  %v1855_v3 = vld [vmem:[%s2649_s3 + $0x18] sm:$0xff]  ;;  %v1854_v4 = vld [vmem:[%s2649_s3 + $0x10] sm:$0xff]  ;;  %v1853_v5 = vld [vmem:[%s2649_s3 + $0x8] sm:$0xff] }
  0x22   :  { %518 = vmatpush.bf16.msrb.mxu0 %v1842_v32  ;;  %487 = vmatmul.bf16.vlgmr.msra.gmra.mxu1 %v60_v37  ;;  %v1852_v8 = vld [vmem:[%s2649_s3] sm:$0xff]  ;;  %v1863_v11 = vld [vmem:[%s2651_s5 + $0x18] sm:$0xff]  ;;  %v1862_v14 = vld [vmem:[%s2651_s5 + $0x10] sm:$0xff] }
  0x23   :  { %531 = vmatpush.bf16.msrb.mxu1 %v1850_v33  ;;  %500 = vmatmul.bf16.vlgmr.msra.gmra.mxu2 %v61_v43  ;;  %v1927_v15 = vld [vmem:[%s2648_s2] ss:$0 sm:$0xff]  ;;  %v1861_v16 = vld [vmem:[%s2651_s5 + $0x8] sm:$0xff]  ;;  %v1864_v36 = vld [vmem:[%s2653_s7] sm:$0x30] }
  0x24   :  { %551 = vmatpush.bf16.msrb.mxu2 %v1851_v39  ;;  %513 = vmatmul.bf16.vlgmr.msra.gmra.mxu3 %v62_v44  ;;  %v1860_v34 = vld [vmem:[%s2651_s5] sm:$0xff] }
  0x25   :  { %627 = vmatpush.bf16.msrb.mxu3 %v1859_v63  ;;  %v1554_v35 = vld [vmem:[%s2653_s7] sm:$0xf] }
  0x26   :  { %519 = vmatpush.bf16.msrb.mxu0 %v1841_v41  ;;  %v1555_v37 = vor.u32 %v1864_v36, %v1554_v35  ;;  %v1928_v39 = vld [vmem:[%s2650_s4] ss:$0 sm:$0xff]  ;;  %v1902_v35 = vld [vmem:[%s2659_s13 + $0x100] sm:$0xf0] }
  0x27   :  { %532 = vmatpush.bf16.msrb.mxu1 %v1849_v42 }
  0x28   :  { %686 = vmatpush.bf16.msra.mxu2 %v1863_v11  ;;  %v714_v38 = vsel %vm712_vm1, %v1555_v37, 0  ;;  %v1915_v11 = vld [vmem:[%s2659_s13 + $0x168] sm:$0xf0]  ;;  %v1913_v37 = vld [vmem:[%s2659_s13 + $0x15c] sm:$0xf] }
  0x29   :  { %628 = vmatpush.bf16.msrb.mxu3 %v1858_v0  ;;  %v1866_v0 = vld [vmem:[%s2657_s11] sm:$0xff] }
  0x2a   :  { %520 = vmatpush.bf16.msrb.mxu0 %v1840_v45  ;;  %v1559_v45 = vld [vmem:[%s2655_s9] sm:$0xf] }
  0x2b   :  { %533 = vmatpush.bf16.msrb.mxu1 %v1848_v46  ;;  %v1865_v46 = vld [vmem:[%s2655_s9] sm:$0x30] }
  0x2c   :  { %687 = vmatpush.bf16.msra.mxu2 %v1862_v14  ;;  %v1751_v14 = vld [vmem:[%s2659_s13 + $0x16c] sm:$0xf0] }
  0x2d   :  { %629 = vmatpush.bf16.msrb.mxu3 %v1857_v1  ;;  %v1777_v1 = vld [vmem:[%s2659_s13 + $0x188] sm:$0xf] }
  0x2e   :  { %521 = vmatpush.bf16.msrb.mxu0 %v1839_v47  ;;  %v1560_v47 = vor.u32 %v1865_v46, %v1559_v45  ;;  %v1667_v45 = vld [vmem:[%s2659_s13 + $0xc4] sm:$0xf0]  ;;  %v1673_v46 = vld [vmem:[%s2659_s13 + $0xb0] sm:$0xf] }
  0x2f   :  { %534 = vmatpush.bf16.msrb.mxu1 %v1847_v48 }
  0x30   :  { %688 = vmatpush.bf16.msra.mxu2 %v1861_v16  ;;  %v746_v48 = vsel %vm712_vm1, %v1560_v47, 0  ;;  %v1916_v16 = vld [vmem:[%s2659_s13 + $0x170] sm:$0xf0] }
  0x31   :  { %630 = vmatpush.bf16.msrb.mxu3 %v1856_v2  ;;  %v1922_v2 = vld [vmem:[%s2659_s13 + $0x1a0] sm:$0xf0] }
  0x32   :  { %522 = vmatpush.bf16.msrb.mxu0 %v1838_v49  ;;  %v1929_v49 = vld [vmem:[%s2652_s6] ss:$0 sm:$0xff] }
  0x33   :  { %535 = vmatpush.bf16.msrb.mxu1 %v1846_v50  ;;  %1502 = vmatmul.msk.bf16.vlgmr.msrb.gmra.mxu2 %vm462_vm0, %v65_v54 }
  0x34   :  { %689 = vmatpush.bf16.msra.mxu2 %v1860_v34  ;;  %v1701_v34 = vld [vmem:[%s2659_s13 + $0xe8] sm:$0xf] }
  0x35   :  { %631 = vmatpush.bf16.msrb.mxu3 %v1855_v3  ;;  %v1919_v3 = vld [vmem:[%s2659_s13 + $0x18c] sm:$0xf] }
  0x36   :  { %523 = vmatpush.bf16.msrb.mxu0 %v1837_v52 }
  0x37   :  { %536 = vmatpush.bf16.msrb.mxu1 %v1845_v53 }
  0x38   :  { %723 = vmatpush.bf16.msrb.mxu2 %v714_v38 }
  0x39   :  { %632 = vmatpush.bf16.msrb.mxu3 %v1854_v4  ;;  %v1778_v4 = vor.u32 %v1922_v2, %v1777_v1  ;;  %v1609_v1 = vld [vmem:[%s2659_s13 + $0x38] sm:$0xf]  ;;  %v1880_v2 = vld [vmem:[%s2659_s13 + $0x50] sm:$0xf0] }
  0x3a   :  { %524 = vmatpush.bf16.msrb.mxu0 %v1836_v55  ;;  %v1869_v55 = vld [vmem:[%s2657_s11 + $0x18] sm:$0xff] }
  0x3b   :  { %537 = vmatpush.bf16.msrb.mxu1 %v1844_v56  ;;  %v1868_v56 = vld [vmem:[%s2657_s11 + $0x10] sm:$0xff] }
  0x3d   :  { %633 = vmatpush.bf16.msrb.mxu3 %v1853_v5  ;;  %v1779_v5 = vld [vmem:[%s2659_s13 + $0x1a4] sm:$0xf0] }
  0x3e   :  { %525 = vmatpush.bf16.msrb.mxu0 %v1835_v57  ;;  %v1867_v57 = vld [vmem:[%s2657_s11 + $0x8] sm:$0xff] }
  0x3f   :  { %538 = vmatpush.bf16.msrb.mxu1 %v1843_v58  ;;  %v1930_v58 = vld [vmem:[%s2654_s8] ss:$0 sm:$0xff] }
  0x41   :  { %526 = vmatmul.bf16.vlgmr.msrb.gmra.mxu0 %v63_v61  ;;  %634 = vmatpush.bf16.msrb.mxu3 %v1852_v8  ;;  %v1782_v8 = vor.u32 %v1919_v3, %v1779_v5 }
  0x42   :  { %539 = vmatmul.bf16.vlgmr.msrb.gmra.mxu1 %v64_v62 }
  0x43   :  { %755 = vmatpush.bf16.msra.mxu1 %v746_v48  ;;  %1198 = vmatpush.bf16.msra.mxu0 %v1782_v8  ;;  %v1895_v48 = vld [vmem:[%s2659_s13 + $0xc8] sm:$0xf0]  ;;  %v1675_v8 = vld [vmem:[%s2659_s13 + $0xcc] sm:$0xf0] }
  0x45   :  { %1185 = vmatpush.bf16.msra.mxu3 %v1778_v4 }
  0x9e   :  { %v475_v6 = vpop.f32.mrf.mxu0 }
  0x9f   :  { %v488_v7 = vpop.f32.mrf.mxu1  ;;  %v476_v17 = vadd.f32 %v1927_v15, %v475_v6  ;;  %v1785_v6 = vld [vmem:[%s2659_s13 + $0x190] sm:$0xf]  ;;  %v1757_v15 = vld [vmem:[%s2659_s13 + $0x158] sm:$0xf] }
  0xa1   :  { %v489_v20 = vadd.f32 %v488_v7, %v476_v17  ;;  %v1923_v7 = vld [vmem:[%s2659_s13 + $0x1a8] sm:$0xf0] }
  0xa6   :  { %v477_v9 = vpop.f32.mrf.mxu0  ;;  %v501_v12 = vpop.f32.mrf.mxu2 }
  0xa7   :  { %v490_v10 = vpop.f32.mrf.mxu1  ;;  %v514_v13 = vpop.f32.mrf.mxu3  ;;  %v502_v21 = vadd.f32 %v501_v12, %v489_v20  ;;  %v1786_v9 = vor.u32 %v1923_v7, %v1785_v6  ;;  %v1912_v12 = vld [vmem:[%s2659_s13 + $0x154] sm:$0xf]  ;;  %v1877_v6 = vld [vmem:[%s2659_s13 + $0x3c] sm:$0xf] }
  0xa8   :  { %v1749_v10 = vld [vmem:[%s2659_s13 + $0x150] sm:$0xf]  ;;  %v1754_v17 = vor.u32 %v1912_v12, %v1751_v14  ;;  %v1908_v20 = vld [vmem:[%s2659_s13 + $0x130] sm:$0xf0]  ;;  %v1610_v12 = vor.u32 %v1880_v2, %v1609_v1  ;;  %v1873_v14 = vld [vmem:[%s2659_s13 + $0x18] sm:$0xf0] }
  0xa9   :  { %v515_v23 = vadd.f32 %v514_v13, %v502_v21  ;;  %v1750_v13 = vor.u32 %v1915_v11, %v1749_v10  ;;  %1211 = vmatpush.bf16.msrb.mxu1 %v1786_v9  ;;  %v1905_v21 = vld [vmem:[%s2659_s13 + $0x11c] sm:$0xf]  ;;  %v1892_v7 = vld [vmem:[%s2659_s13 + $0xb4] sm:$0xf]  ;;  %v1611_v9 = vld [vmem:[%s2659_s13 + $0x54] sm:$0xf0] }
  0xaa   :  { %1199 = vmatpush.bf16.msra.mxu0 %v1754_v17  ;;  %v1617_v10 = vld [vmem:[%s2659_s13 + $0x40] sm:$0xf]  ;;  %v1881_v11 = vld [vmem:[%s2659_s13 + $0x58] sm:$0xf0]  ;;  %v1709_v1 = vld [vmem:[%s2659_s13 + $0xf0] sm:$0xf] }
  0xab   :  { %1186 = vmatpush.bf16.msra.mxu3 %v1750_v13  ;;  %v1581_v13 = vld [vmem:[%s2659_s13] sm:$0xf] }
  0xae   :  { %v503_v18 = vpop.f32.mrf.mxu2 }
  0xaf   :  { %v516_v19 = vpop.f32.mrf.mxu3  ;;  %v1758_v18 = vor.u32 %v1916_v16, %v1757_v15  ;;  %v1870_v15 = vld [vmem:[%s2659_s13 + $0x4] sm:$0xf]  ;;  %v1678_v16 = vor.u32 %v1892_v7, %v1675_v8  ;;  %v1717_v8 = vld [vmem:[%s2659_s13 + $0xf8] sm:$0xf] }
  0xb0   :  { %v1721_v19 = vld [vmem:[%s2659_s13 + $0x118] sm:$0xf] }
  0xb1   :  { %1212 = vmatpush.bf16.msrb.mxu1 %v1758_v18  ;;  %v1614_v18 = vor.u32 %v1877_v6, %v1611_v9  ;;  %v1904_v9 = vld [vmem:[%s2659_s13 + $0x110] sm:$0xf0] }
  0xb6   :  { %v553_v22 = vpop.f32.mrf.mxu2 }
  0xbe   :  { %v527_v24 = vpop.f32.mrf.mxu0  ;;  %v555_v28 = vpop.f32.mrf.mxu2 }
  0xbf   :  { %v540_v25 = vpop.f32.mrf.mxu1  ;;  %v528_v26 = vadd.f32 %v527_v24, %v515_v23  ;;  %v1729_v23 = vld [vmem:[%s2659_s13 + $0x120] sm:$0xf]  ;;  %v1909_v24 = vld [vmem:[%s2659_s13 + $0x138] sm:$0xf0] }
  0xc1   :  { %v541_v27 = vadd.f32 %v540_v25, %v528_v26  ;;  %v1722_v25 = vor.u32 %v1908_v20, %v1721_v19  ;;  %v1693_v26 = vld [vmem:[%s2659_s13 + $0xe0] sm:$0xf]  ;;  %v1618_v19 = vor.u32 %v1881_v11, %v1617_v10  ;;  %v1718_v10 = vor.u32 %v1904_v9, %v1717_v8  ;;  %v1681_v11 = vld [vmem:[%s2659_s13 + $0xb8] sm:$0xf] }
  0xc2   :  { %v1583_v20 = vld [vmem:[%s2659_s13 + $0x1c] sm:$0xf0] }
  0xc3   :  { %v554_v29 = vadd.f32 %v553_v22, %v541_v27  ;;  %v1723_v22 = vld [vmem:[%s2659_s13 + $0x134] sm:$0xf0]  ;;  %v1901_v27 = vld [vmem:[%s2659_s13 + $0xf8] sm:$0xf0]  ;;  %1187 = vmatpush.bf16.msra.mxu3 %v1722_v25  ;;  %v1924_v25 = vld [vmem:[%s2659_s13 + $0x1b0] sm:$0xf0] }
  0xc4   :  { %v1726_v28 = vor.u32 %v1905_v21, %v1723_v22  ;;  %v1694_v38 = vor.u32 %v1901_v27, %v1693_v26  ;;  %v1589_v21 = vld [vmem:[%s2659_s13 + $0x8] sm:$0xf]  ;;  %v1874_v22 = vld [vmem:[%s2659_s13 + $0x20] sm:$0xf0]  ;;  %v1921_v26 = vld [vmem:[%s2659_s13 + $0x19c] sm:$0xf] }
  0xc5   :  { %v557_v30 = vmax.f32 %v554_v29, 0.0  ;;  %v1730_v29 = vor.u32 %v1909_v24, %v1729_v23  ;;  %v1793_v24 = vld [vmem:[%s2659_s13 + $0x198] sm:$0xf] }
  0xc6   :  { %v529_v31 = vpop.f32.mrf.mxu0  ;;  %1200 = vmatpush.bf16.msra.mxu0 %v1726_v28  ;;  %v1795_v27 = vld [vmem:[%s2659_s13 + $0x1b4] sm:$0xf0]  ;;  %v1801_v28 = vld [vmem:[%s2659_s13 + $0x1a0] sm:$0xf] }
  0xc7   :  { %v542_v32 = vpop.f32.mrf.mxu1  ;;  %v558_v33 = vpack.c.bf16 %v557_v30, %v557_v30  ;;  %v1898_v30 = vld [vmem:[%s2659_s13 + $0xe4] sm:$0xf]  ;;  %v1920_v31 = vld [vmem:[%s2659_s13 + $0x194] sm:$0xf]  ;;  %1213 = vmatpush.bf16.msrb.mxu1 %v1730_v29  ;;  %1188 = vmatpush.bf16.msra.mxu3 %v1694_v38  ;;  %v1925_v29 = vld [vmem:[%s2659_s13 + $0x1b8] sm:$0xf0]  ;;  %v1798_v38 = vor.u32 %v1921_v26, %v1795_v27 }
  0xc8   :  { %v1787_v32 = vld [vmem:[%s2659_s13 + $0x1ac] sm:$0xf0]  ;;  %v1890_v26 = vld [vmem:[%s2659_s13 + $0xa0] sm:$0xf0] }
  0xc9   :  { %635 = vmatmul.bf16.vlgmr.msrb.gmra.mxu3 %v558_v33  ;;  %v1695_v33 = vld [vmem:[%s2659_s13 + $0xfc] sm:$0xf0]  ;;  %v1790_v36 = vor.u32 %v1920_v31, %v1787_v32  ;;  %v1582_v31 = vor.u32 %v1873_v14, %v1581_v13  ;;  %v1885_v32 = vld [vmem:[%s2659_s13 + $0x7c] sm:$0xf] }
  0xca   :  { %v1893_v13 = vld [vmem:[%s2659_s13 + $0xbc] sm:$0xf] }
 0x14c   :  { %v636_v40 = vpop.f32.mrf.mxu3 }
 0x14d   :  { %v637_v41 = vadd.f32 %v1928_v39, %v636_v40  ;;  %v1665_v39 = vld [vmem:[%s2659_s13 + $0xa8] sm:$0xf]  ;;  %v1894_v40 = vld [vmem:[%s2659_s13 + $0xc0] sm:$0xf0] }
 0x14f   :  { %v640_v42 = vmax.f32 %v637_v41, 0.0  ;;  %v1759_v41 = vld [vmem:[%s2659_s13 + $0x174] sm:$0xf0] }
 0x150   :  { %v1762_v47 = vor.u32 %v1913_v37, %v1759_v41  ;;  %v1794_v37 = vor.u32 %v1924_v25, %v1793_v24  ;;  %v1655_v24 = vld [vmem:[%s2659_s13 + $0x9c] sm:$0xf0]  ;;  %v1661_v25 = vld [vmem:[%s2659_s13 + $0x88] sm:$0xf] }
 0x151   :  { %v641_v43 = vpack.c.bf16 %v640_v42, %v640_v42  ;;  %v1698_v42 = vor.u32 %v1898_v30, %v1695_v33  ;;  %v1647_v33 = vld [vmem:[%s2659_s13 + $0x94] sm:$0xf0] }
 0x152   :  { %v1650_v41 = vor.u32 %v1885_v32, %v1647_v33  ;;  %v1627_v32 = vld [vmem:[%s2659_s13 + $0x64] sm:$0xf0]  ;;  %v1633_v33 = vld [vmem:[%s2659_s13 + $0x50] sm:$0xf] }
 0x153   :  { %1551 = vmatmul.msk.bf16.vlgmr.msra.gmra.mxu2 %vm678_vm2, %v641_v43  ;;  %v1702_v43 = vor.u32 %v1902_v35, %v1701_v34  ;;  %1201 = vmatpush.bf16.msra.mxu0 %v1698_v42  ;;  %v1586_v34 = vor.u32 %v1870_v15, %v1583_v20  ;;  %v1590_v35 = vor.u32 %v1874_v22, %v1589_v21  ;;  %v1917_v42 = vld [vmem:[%s2659_s13 + $0x178] sm:$0xf0]  ;;  %v1683_v15 = vld [vmem:[%s2659_s13 + $0xd4] sm:$0xf0]  ;;  %v1653_v20 = vld [vmem:[%s2659_s13 + $0x80] sm:$0xf] }
 0x154   :  { %v638_v44 = vpop.f32.mrf.mxu3  ;;  %806 = vmatpush.bf16.msra.mxu2 %v1869_v55  ;;  %v1889_v21 = vld [vmem:[%s2659_s13 + $0x98] sm:$0xf0]  ;;  %v1886_v22 = vld [vmem:[%s2659_s13 + $0x84] sm:$0xf] }
 0x155   :  { %v1891_v44 = vld [vmem:[%s2659_s13 + $0xac] sm:$0xf]  ;;  %1214 = vmatpush.bf16.msrb.mxu1 %v1702_v43  ;;  %v1914_v43 = vld [vmem:[%s2659_s13 + $0x164] sm:$0xf]  ;;  %v1658_v27 = vor.u32 %v1886_v22, %v1655_v24 }
 0x156   :  { %v1670_v55 = vor.u32 %v1891_v44, %v1667_v45  ;;  %v1767_v44 = vld [vmem:[%s2659_s13 + $0x17c] sm:$0xf0]  ;;  %v1773_v45 = vld [vmem:[%s2659_s13 + $0x168] sm:$0xf] }
 0x158   :  { %807 = vmatpush.bf16.msra.mxu2 %v1868_v56  ;;  %v1674_v56 = vor.u32 %v1895_v48, %v1673_v46  ;;  %1202 = vmatpush.bf16.msra.mxu0 %v1670_v55  ;;  %v1918_v46 = vld [vmem:[%s2659_s13 + $0x180] sm:$0xf0] }
 0x159   :  { %v1910_v55 = vld [vmem:[%s2659_s13 + $0x140] sm:$0xf0] }
 0x15a   :  { %1215 = vmatpush.bf16.msrb.mxu1 %v1674_v56  ;;  %v1907_v56 = vld [vmem:[%s2659_s13 + $0x12c] sm:$0xf] }
 0x15c   :  { %808 = vmatpush.bf16.msra.mxu2 %v1867_v57  ;;  %v1884_v57 = vld [vmem:[%s2659_s13 + $0x74] sm:$0xf] }
 0x160   :  { %809 = vmatpush.bf16.msra.mxu2 %v1866_v0 }
 0x1d6   :  { %v691_v50 = vpop.f32.mrf.mxu2 }
 0x1d7   :  { %v692_v51 = vadd.f32 %v1929_v49, %v691_v50  ;;  %v1906_v49 = vld [vmem:[%s2659_s13 + $0x124] sm:$0xf]  ;;  %v1731_v50 = vld [vmem:[%s2659_s13 + $0x13c] sm:$0xf0] }
 0x1d9   :  { %v695_v52 = vmax.f32 %v692_v51, 0.0  ;;  %v1666_v51 = vor.u32 %v1894_v40, %v1665_v39  ;;  %v1765_v39 = vld [vmem:[%s2659_s13 + $0x160] sm:$0xf]  ;;  %v1802_v40 = vor.u32 %v1925_v29, %v1801_v28  ;;  %v1662_v28 = vor.u32 %v1890_v26, %v1661_v25  ;;  %v1625_v29 = vld [vmem:[%s2659_s13 + $0x48] sm:$0xf] }
 0x1da   :  { %v1766_v48 = vor.u32 %v1917_v42, %v1765_v39  ;;  %v1875_v39 = vld [vmem:[%s2659_s13 + $0x28] sm:$0xf0]  ;;  %v1605_v42 = vld [vmem:[%s2659_s13 + $0x18] sm:$0xf] }
 0x1db   :  { %v696_v53 = vpack.c.bf16 %v695_v52, %v695_v52  ;;  %v1637_v52 = vld [vmem:[%s2659_s13 + $0x70] sm:$0xf]  ;;  %1189 = vmatpush.bf16.msra.mxu3 %v1666_v51  ;;  %v1878_v51 = vld [vmem:[%s2659_s13 + $0x44] sm:$0xf] }
 0x1dd   :  { %1556 = vmatmul.msk.bf16.vlgmr.msrb.gmra.mxu2 %vm708_vm3, %v696_v53  ;;  %v1887_v53 = vld [vmem:[%s2659_s13 + $0x88] sm:$0xf0] }
 0x1de   :  { %v693_v54 = vpop.f32.mrf.mxu2  ;;  %1224 = vmatpush.bf16.msrb.mxu2 %v1790_v36  ;;  %v1638_v0 = vor.u32 %v1887_v53, %v1637_v52  ;;  %v1619_v52 = vld [vmem:[%s2659_s13 + $0x5c] sm:$0xf0]  ;;  %v1737_v53 = vld [vmem:[%s2659_s13 + $0x128] sm:$0xf] }
 0x1df   :  { %v1734_v54 = vor.u32 %v1906_v49, %v1731_v50  ;;  %v1770_v49 = vor.u32 %v1914_v43, %v1767_v44  ;;  %v1774_v50 = vor.u32 %v1918_v46, %v1773_v45  ;;  %v1876_v43 = vld [vmem:[%s2659_s13 + $0x30] sm:$0xf0] }
 0x1e0   :  { %1190 = vmatpush.bf16.msra.mxu3 %v1638_v0  ;;  %v1591_v0 = vld [vmem:[%s2659_s13 + $0x24] sm:$0xf0]  ;;  %v1606_v46 = vor.u32 %v1876_v43, %v1605_v42 }
 0x1e2   :  { %1225 = vmatpush.bf16.msrb.mxu2 %v1762_v47 }
 0x1e4   :  { %1191 = vmatpush.bf16.msra.mxu3 %v1610_v12  ;;  %v1896_v12 = vld [vmem:[%s2659_s13 + $0xd0] sm:$0xf0] }
 0x1e5   :  { %v1682_v14 = vor.u32 %v1896_v12, %v1681_v11 }
 0x1e6   :  { %1226 = vmatpush.bf16.msrb.mxu2 %v1734_v54  ;;  %v1622_v54 = vor.u32 %v1878_v51, %v1619_v52 }
 0x1e8   :  { %1192 = vmatpush.bf16.msra.mxu3 %v1582_v31  ;;  %v1879_v31 = vld [vmem:[%s2659_s13 + $0x4c] sm:$0xf] }
 0x1ec   :  { %1237 = vmatpush.bf16.msrb.mxu3 %v1794_v37 }
 0x1f0   :  { %1238 = vmatpush.bf16.msrb.mxu3 %v1766_v48 }
 0x260   :  { %v725_v59 = vpop.f32.mrf.mxu2 }
 0x261   :  { %v726_v60 = vadd.f32 %v1930_v58, %v725_v59  ;;  %v1899_v58 = vld [vmem:[%s2659_s13 + $0xec] sm:$0xf]  ;;  %v1703_v59 = vld [vmem:[%s2659_s13 + $0x104] sm:$0xf0] }
 0x262   :  { %v1706_v3 = vor.u32 %v1899_v58, %v1703_v59  ;;  %v1738_v58 = vor.u32 %v1910_v55, %v1737_v53  ;;  %v881_v53 = vld [vmem:[%s2660_s14] sm:$0x7f] }
 0x263   :  { %v729_v61 = vmax.f32 %v726_v60, 0.0  ;;  %v1639_v60 = vld [vmem:[%s2659_s13 + $0x8c] sm:$0xf0]  ;;  %v885_v55 = vperm.slane %v881_v53, 2  ;;  %v889_v8 = vperm.slane %v881_v53, 6 }
 0x264   :  { %v1642_v4 = vor.u32 %v1884_v57, %v1639_v60  ;;  %1227 = vmatpush.bf16.msrb.mxu2 %v1706_v3  ;;  %v1739_v57 = vld [vmem:[%s2659_s13 + $0x144] sm:$0xf0]  ;;  %v1745_v60 = vld [vmem:[%s2659_s13 + $0x130] sm:$0xf]  ;;  %1239 = vmatpush.bf16.msrb.mxu3 %v1738_v58  ;;  %v1903_v3 = vld [vmem:[%s2659_s13 + $0x108] sm:$0xf0] }
 0x265   :  { %v730_v62 = vpack.c.bf16 %v729_v61, %v729_v61  ;;  %v1645_v61 = vld [vmem:[%s2659_s13 + $0x78] sm:$0xf]  ;;  %v1742_v59 = vor.u32 %v1907_v56, %v1739_v57  ;;  %v1710_v6 = vor.u32 %v1903_v3, %v1709_v1 }
 0x266   :  { %1203 = vmatpush.bf16.msra.mxu0 %v1642_v4  ;;  %v1900_v4 = vld [vmem:[%s2659_s13 + $0xf4] sm:$0xf] }
 0x267   :  { %1561 = vmatmul.msk.bf16.vlgmr.msra.gmra.mxu1 %vm708_vm3, %v730_v62  ;;  %v1888_v62 = vld [vmem:[%s2659_s13 + $0x90] sm:$0xf0] }
 0x268   :  { %v727_v63 = vpop.f32.mrf.mxu2  ;;  %v1646_v5 = vor.u32 %v1888_v62, %v1645_v61  ;;  %1228 = vmatpush.bf16.msrb.mxu2 %v1678_v16  ;;  %v1911_v61 = vld [vmem:[%s2659_s13 + $0x148] sm:$0xf0]  ;;  %1240 = vmatpush.bf16.msrb.mxu3 %v1710_v6  ;;  %v1689_v16 = vld [vmem:[%s2659_s13 + $0xc0] sm:$0xf]  ;;  %v888_v6 = vperm.slane %v881_v53, 5 }
 0x269   :  { %v1931_v63 = vld [vmem:[%s2656_s10] ss:$0 sm:$0xff]  ;;  %v1746_v62 = vor.u32 %v1911_v61, %v1745_v60  ;;  %v883_v60 = vperm.slane %v881_v53, 0  ;;  %v886_v61 = vperm.slane %v881_v53, 3  ;;  %s1297_s10 = sshll.u32 %s2661_s15, 4  ;;  %s1298_s10 = int_to_ptr.hbm [resolvable:$true] %s1297_s10 }
 0x26a   :  { %1216 = vmatpush.bf16.msrb.mxu1 %v1646_v5  ;;  %1204 = vmatpush.bf16.msra.mxu0 %v1614_v18  ;;  %v1711_v5 = vld [vmem:[%s2659_s13 + $0x10c] sm:$0xf0]  ;;  %v1686_v18 = vor.u32 %v1893_v13, %v1683_v15 }
 0x26b   :  { %v1714_v7 = vor.u32 %v1900_v4, %v1711_v5 }
 0x26c   :  { %1229 = vmatpush.bf16.msrb.mxu2 %v1650_v41  ;;  %1241 = vmatpush.bf16.msrb.mxu3 %v1682_v14  ;;  %v1599_v41 = vld [vmem:[%s2659_s13 + $0x2c] sm:$0xf0] }
 0x26e   :  { %1217 = vmatpush.bf16.msrb.mxu1 %v1618_v19  ;;  %1205 = vmatpush.bf16.msra.mxu0 %v1586_v34  ;;  %v1883_v34 = vld [vmem:[%s2659_s13 + $0x68] sm:$0xf0] }
 0x26f   :  { %v1634_v37 = vor.u32 %v1883_v34, %v1633_v33 }
 0x270   :  { %1230 = vmatpush.bf16.msrb.mxu2 %v1622_v54  ;;  %v884_v54 = vperm.slane %v881_v53, 1 }
 0x272   :  { %1218 = vmatpush.bf16.msrb.mxu1 %v1590_v35  ;;  %1250 = vmatpush.bf16.msrb.mxu0 %v1798_v38  ;;  %v1597_v38 = vld [vmem:[%s2659_s13 + $0x10] sm:$0xf] }
 0x273   :  { %v1598_v44 = vor.u32 %v1875_v39, %v1597_v38 }
 0x276   :  { %1263 = vmatpush.bf16.msra.mxu1 %v1802_v40  ;;  %1251 = vmatpush.bf16.msrb.mxu0 %v1770_v49  ;;  %v1872_v40 = vld [vmem:[%s2659_s13 + $0x14] sm:$0xf] }
 0x277   :  { %v1602_v45 = vor.u32 %v1872_v40, %v1599_v41 }
 0x27a   :  { %1264 = vmatpush.bf16.msra.mxu1 %v1774_v50  ;;  %1252 = vmatpush.bf16.msrb.mxu0 %v1742_v59 }
 0x27e   :  { %1265 = vmatpush.bf16.msra.mxu1 %v1746_v62  ;;  %1253 = vmatpush.bf16.msrb.mxu0 %v1714_v7 }
 0x282   :  { %1266 = vmatpush.bf16.msra.mxu1 %v1718_v10  ;;  %1254 = vmatpush.bf16.msrb.mxu0 %v1686_v18 }
 0x286   :  { %1255 = vmatpush.bf16.msrb.mxu0 %v1658_v27 }
 0x2e4   :  { %v757_v17 = vpop.f32.mrf.mxu1 }
 0x2e5   :  { %v758_v23 = vadd.f32 %v1931_v63, %v757_v17  ;;  %v1871_v63 = vld [vmem:[%s2659_s13 + $0xc] sm:$0xf]  ;;  %v1897_v17 = vld [vmem:[%s2659_s13 + $0xd8] sm:$0xf0] }
 0x2e6   :  { %v1594_v2 = vor.u32 %v1871_v63, %v1591_v0  ;;  %v1690_v19 = vor.u32 %v1897_v17, %v1689_v16  ;;  %v887_v16 = vperm.slane %v881_v53, 4 }
 0x2e7   :  { %v761_v30 = vmax.f32 %v758_v23, 0.0  ;;  %v1654_v23 = vor.u32 %v1889_v21, %v1653_v20 }
 0x2e8   :  { %1231 = vmatpush.bf16.msrb.mxu2 %v1594_v2  ;;  %1267 = vmatpush.bf16.msra.mxu1 %v1690_v19 }
 0x2e9   :  { %v762_v36 = vpack.c.bf16 %v761_v30, %v761_v30  ;;  %v1882_v30 = vld [vmem:[%s2659_s13 + $0x60] sm:$0xf0]  ;;  %1242 = vmatpush.bf16.msrb.mxu3 %v1654_v23 }
 0x2ea   :  { %v1626_v35 = vor.u32 %v1882_v30, %v1625_v29 }
 0x2eb   :  { %1578 = vmatmul.msk.bf16.vlgmr.msra.gmra.mxu2 %vm678_vm2, %v762_v36  ;;  %v1630_v36 = vor.u32 %v1879_v31, %v1627_v32 }
 0x2ec   :  { %v759_v47 = vpop.f32.mrf.mxu1  ;;  %1268 = vmatpush.bf16.msra.mxu1 %v1662_v28 }
 0x2ed   :  { %1243 = vmatpush.bf16.msrb.mxu3 %v1626_v35  ;;  %1256 = vmatpush.bf16.msrb.mxu0 %v1630_v36  ;;  %v1932_v47 = vld [vmem:[%s2658_s12] ss:$0 sm:$0xff]  ;;  %s1973_s12 = smov [#allocation2]  }
 0x2ee   :  { %s1295_s14 = sshll.u32 %s1973_s12, 4  ;;  %s1296_s14 = int_to_ptr.vmem [resolvable:$true] %s1295_s14 }
 0x2f0   :  { %1269 = vmatpush.bf16.msra.mxu1 %v1634_v37 }
 0x2f1   :  { %1244 = vmatpush.bf16.msrb.mxu3 %v1598_v44  ;;  %1257 = vmatpush.bf16.msrb.mxu0 %v1602_v45 }
 0x2f4   :  { %1270 = vmatpush.bf16.msra.mxu1 %v1606_v46 }
 0x36e   :  { %v811_v48 = vpop.f32.mrf.mxu2 }
 0x36f   :  { %v812_v49 = vadd.f32 %v1932_v47, %v811_v48 }
 0x371   :  { %v815_v50 = vmax.f32 %v812_v49, 0.0 }
 0x373   :  { %v816_v51 = vpack.c.bf16 %v815_v50, %v815_v50 }
 0x375   :  { %1193 = vmatmul.bf16.vlgmr.msra.gmra.mxu3 %v816_v51  ;;  %1206 = vmatmul.bf16.vlgmr.msra.gmra.mxu0 %v816_v51 }
 0x376   :  { %1219 = vmatmul.bf16.vlgmr.msrb.gmra.mxu1 %v816_v51  ;;  %1232 = vmatmul.bf16.vlgmr.msrb.gmra.mxu2 %v816_v51  ;;  %v813_v52 = vpop.f32.mrf.mxu2 }
 0x385   :  { %1245 = vmatmul.bf16.vlgmr.msrb.gmra.mxu3 %v816_v51  ;;  %1258 = vmatmul.bf16.vlgmr.msrb.gmra.mxu0 %v816_v51 }
 0x386   :  { %1271 = vmatmul.bf16.vlgmr.msra.gmra.mxu1 %v816_v51 }
 0x3f2   :  { %v1207_v56 = vpop.f32.mrf.mxu0 }
 0x3f3   :  { %v1208_v57 = vadd.f32 %v1207_v56, %v884_v54  ;;  %v1220_v58 = vpop.f32.mrf.mxu1 }
 0x3f4   :  { %v1221_v59 = vadd.f32 %v1220_v58, %v885_v55 }
 0x3f5   :  { %1933 = vtanh.f32 %v1208_v57 }
 0x3f6   :  { %1935 = vtanh.f32 %v1221_v59 }
 0x3f8   :  { %v1194_v62 = vpop.f32.mrf.mxu3 }
 0x3f9   :  { %v1195_v63 = vadd.f32 %v1194_v62, %v883_v60  ;;  %v1233_v0 = vpop.f32.mrf.mxu2 }
 0x3fa   :  { %v1234_v1 = vadd.f32 %v1233_v0, %v886_v61  ;;  %v1209_v2 = vpop.f32.mrf.mxu0 }
 0x3fb   :  { %v1934_v3 = vpop.eup %1933  ;;  %1937 = vtanh.f32 %v1195_v63  ;;  %v1222_v4 = vpop.f32.mrf.mxu1 }
 0x3fc   :  { %v1936_v5 = vpop.eup %1935  ;;  %1284 = vst [vmem:[#allocation2 + $0x8] sm:$0xff] %v1934_v3  ;;  %1939 = vtanh.f32 %v1234_v1 }
 0x3fd   :  { %1285 = vst [vmem:[#allocation2 + $0x10] sm:$0xff] %v1936_v5 }
 0x400   :  { %v1196_v7 = vpop.f32.mrf.mxu3 }
 0x401   :  { %v1938_v9 = vpop.eup %1937  ;;  %v1235_v10 = vpop.f32.mrf.mxu2 }
 0x402   :  { %v1940_v11 = vpop.eup %1939  ;;  %1283 = vst [vmem:[#allocation2] sm:$0xff] %v1938_v9  ;;  %v1259_v12 = vpop.f32.mrf.mxu0 }
 0x403   :  { %1286 = vst [vmem:[#allocation2 + $0x18] sm:$0xff] %v1940_v11  ;;  %v1260_v13 = vadd.f32 %v1259_v12, %v888_v6  ;;  %v1272_v14 = vpop.f32.mrf.mxu1 }
 0x404   :  { %v1273_v15 = vadd.f32 %v1272_v14, %v889_v8 }
 0x405   :  { %1941 = vtanh.f32 %v1260_v13 }
 0x406   :  { %1943 = vtanh.f32 %v1273_v15 }
 0x408   :  { %v1246_v17 = vpop.f32.mrf.mxu3 }
 0x409   :  { %v1247_v18 = vadd.f32 %v1246_v17, %v887_v16 }
 0x40a   :  { %v1261_v19 = vpop.f32.mrf.mxu0 }
 0x40b   :  { %v1942_v20 = vpop.eup %1941  ;;  %1945 = vtanh.f32 %v1247_v18  ;;  %v1274_v21 = vpop.f32.mrf.mxu1 }
 0x40c   :  { %v1944_v22 = vpop.eup %1943  ;;  %1288 = vst [vmem:[#allocation2 + $0x28] sm:$0xff] %v1942_v20 }
 0x40d   :  { %1289 = vst.msk [vmem:[#allocation2 + $0x30] sm:$0xff] %vm462_vm0, %v1944_v22 }
 0x410   :  { %v1248_v23 = vpop.f32.mrf.mxu3 }
 0x411   :  { %v1946_v24 = vpop.eup %1945 }
 0x412   :  { %1287 = vst [vmem:[#allocation2 + $0x20] sm:$0xff] %v1946_v24 }
 0x413   :  { %1300 = dma.vmem_to_hbm [thread:$0]  %s1296_s14, 896, %s1298_s10, [#allocation3]  }
 0x414   :  { %1971 = dma.done.wait [#allocation3], 896  }
 0x415   :  { %1972 = vsyncadd [#allocation3], 4294966400 }
 0x416   :  { %1305 = vsyncpa [#allocation3], 1 }

// kernel: tpu_custom_call.1
= control target key start
LH: loop header
LB: loop body
LE: loop exit
PB: predicated region body
PF: predicated region fallthrough
CT: control target
= control target key end

     0   :  { %s2646_s0 = inlined_call_operand.vmem [shape: f32[8,784], index: 0, kind: input, shape index: {}]   ;;  %s2647_s1 = inlined_call_operand.vmem [shape: bf16[784,128], index: 1, kind: input, shape index: {}]   ;;  %s2648_s2 = inlined_call_operand.vmem [shape: f32[1,128], index: 2, kind: input, shape index: {}]   ;;  %s2649_s3 = inlined_call_operand.vmem [shape: bf16[128,64], index: 3, kind: input, shape index: {}]   ;;  %s2650_s4 = inlined_call_operand.vmem [shape: f32[1,64], index: 4, kind: input, shape index: {}]   ;;  %s2651_s5 = inlined_call_operand.vmem [shape: bf16[64,12], index: 5, kind: input, shape index: {}]   ;;  %s2652_s6 = inlined_call_operand.vmem [shape: f32[1,12], index: 6, kind: input, shape index: {}]   ;;  %s2653_s7 = inlined_call_operand.vmem [shape: bf16[12,12], index: 7, kind: input, shape index: {}]   ;;  %s2654_s8 = inlined_call_operand.vmem [shape: f32[1,12], index: 8, kind: input, shape index: {}]   ;;  %s2655_s9 = inlined_call_operand.vmem [shape: bf16[12,64], index: 9, kind: input, shape index: {}]   ;;  %s2656_s10 = inlined_call_operand.vmem [shape: f32[1,64], index: 10, kind: input, shape index: {}]   ;;  %s2657_s11 = inlined_call_operand.vmem [shape: bf16[64,128], index: 11, kind: input, shape index: {}]   ;;  %s2658_s12 = inlined_call_operand.vmem [shape: f32[1,128], index: 12, kind: input, shape index: {}]   ;;  %s2659_s13 = inlined_call_operand.vmem [shape: bf16[128,784], index: 13, kind: input, shape index: {}]   ;;  %s2660_s14 = inlined_call_operand.vmem [shape: f32[1,784], index: 14, kind: input, shape index: {}]   ;;  %s2661_s15 = inlined_call_operand.hbm [shape: f32[8,784], index: 15, kind: output, shape index: {}]  }
   0x1   :  { %v1810_v0 = vld [vmem:[%s2647_s1 + $0x38] sm:$0xff]  ;;  %v1809_v3 = vld [vmem:[%s2647_s1 + $0x30] sm:$0xff]  ;;  %v1808_v8 = vld [vmem:[%s2647_s1 + $0x28] sm:$0xff] }
   0x2   :  { %v1818_v1 = vld [vmem:[%s2647_s1 + $0x78] sm:$0xff]  ;;  %466 = vmatpush.bf16.msra.mxu0 %v1810_v0  ;;  %v1817_v4 = vld [vmem:[%s2647_s1 + $0x70] sm:$0xff]  ;;  %v1816_v9 = vld [vmem:[%s2647_s1 + $0x68] sm:$0xff] }
   0x3   :  { %v1826_v2 = vld [vmem:[%s2647_s1 + $0xb8] sm:$0xff]  ;;  %479 = vmatpush.bf16.msra.mxu1 %v1818_v1  ;;  %v1825_v5 = vld [vmem:[%s2647_s1 + $0xb0] sm:$0xff]  ;;  %v1824_v10 = vld [vmem:[%s2647_s1 + $0xa8] sm:$0xff] }
   0x4   :  { %492 = vmatpush.bf16.msra.mxu2 %v1826_v2  ;;  %v1834_v6 = vld [vmem:[%s2647_s1 + $0xf8] sm:$0xff]  ;;  %v1833_v7 = vld [vmem:[%s2647_s1 + $0xf0] sm:$0xff]  ;;  %v1832_v11 = vld [vmem:[%s2647_s1 + $0xe8] sm:$0xff] }
   0x5   :  { %505 = vmatpush.bf16.msra.mxu3 %v1834_v6  ;;  %v1807_v12 = vld [vmem:[%s2647_s1 + $0x20] sm:$0xff]  ;;  %v1806_v16 = vld [vmem:[%s2647_s1 + $0x18] sm:$0xff]  ;;  %v1805_v19 = vld [vmem:[%s2647_s1 + $0x10] sm:$0xff] }
   0x6   :  { %467 = vmatpush.bf16.msra.mxu0 %v1809_v3  ;;  %v1815_v13 = vld [vmem:[%s2647_s1 + $0x60] sm:$0xff]  ;;  %v1814_v17 = vld [vmem:[%s2647_s1 + $0x58] sm:$0xff]  ;;  %v1813_v20 = vld [vmem:[%s2647_s1 + $0x50] sm:$0xff] }
   0x7   :  { %480 = vmatpush.bf16.msra.mxu1 %v1817_v4  ;;  %v1823_v14 = vld [vmem:[%s2647_s1 + $0xa0] sm:$0xff]  ;;  %v1822_v18 = vld [vmem:[%s2647_s1 + $0x98] sm:$0xff] }
   0x8   :  { %493 = vmatpush.bf16.msra.mxu2 %v1825_v5  ;;  %v1831_v15 = vld [vmem:[%s2647_s1 + $0xe0] sm:$0xff]  ;;  %v1830_v21 = vld [vmem:[%s2647_s1 + $0xd8] sm:$0xff] }
   0x9   :  { %506 = vmatpush.bf16.msra.mxu3 %v1833_v7 }
   0xa   :  { %468 = vmatpush.bf16.msra.mxu0 %v1808_v8 }
   0xb   :  { %481 = vmatpush.bf16.msra.mxu1 %v1816_v9 }
   0xc   :  { %494 = vmatpush.bf16.msra.mxu2 %v1824_v10 }
   0xd   :  { %507 = vmatpush.bf16.msra.mxu3 %v1832_v11 }
   0xe   :  { %469 = vmatpush.bf16.msra.mxu0 %v1807_v12 }
   0xf   :  { %482 = vmatpush.bf16.msra.mxu1 %v1815_v13 }
  0x10   :  { %495 = vmatpush.bf16.msra.mxu2 %v1823_v14 }
  0x11   :  { %508 = vmatpush.bf16.msra.mxu3 %v1831_v15 }
  0x12   :  { %470 = vmatpush.bf16.msra.mxu0 %v1806_v16 }
  0x13   :  { %483 = vmatpush.bf16.msra.mxu1 %v1814_v17 }
  0x14   :  { %20 = vsyncpa [#allocation3], 0  ;;  %496 = vmatpush.bf16.msra.mxu2 %v1822_v18  ;;  %v1821_v22 = vld [vmem:[%s2647_s1 + $0x90] sm:$0xff]  ;;  %v1804_v24 = vld [vmem:[%s2647_s1 + $0x8] sm:$0xff]  ;;  %vm462_vm0 = vcmask 130048   ;;  %vm712_vm1 = vcmask 1045504  }
  0x15   :  { %509 = vmatpush.bf16.msra.mxu3 %v1830_v21  ;;  %v1829_v23 = vld [vmem:[%s2647_s1 + $0xd0] sm:$0xff]  ;;  %v1812_v25 = vld [vmem:[%s2647_s1 + $0x48] sm:$0xff]  ;;  %v1803_v27 = vld [vmem:[%s2647_s1] sm:$0xff]  ;;  %vm678_vm2 = vcmask 523264   ;;  %vm708_vm3 = vcmask 97280  }
  0x16   :  { %471 = vmatpush.bf16.msra.mxu0 %v1805_v19  ;;  %v1820_v26 = vld [vmem:[%s2647_s1 + $0x88] sm:$0xff]  ;;  %v1811_v29 = vld [vmem:[%s2647_s1 + $0x40] sm:$0xff]  ;;  %v1842_v32 = vld [vmem:[%s2647_s1 + $0x138] sm:$0xff] }
  0x17   :  { %484 = vmatpush.bf16.msra.mxu1 %v1813_v20  ;;  %v1828_v28 = vld [vmem:[%s2647_s1 + $0xc8] sm:$0xff]  ;;  %v52_v30 = vld [vmem:[%s2646_s0] sm:$0xff]  ;;  %v1850_v33 = vld [vmem:[%s2647_s1 + $0x178] sm:$0xff] }
  0x18   :  { %497 = vmatpush.bf16.msra.mxu2 %v1821_v22  ;;  %v53_v31 = vld [vmem:[%s2646_s0 + $0x8] sm:$0xff]  ;;  %v1819_v34 = vld [vmem:[%s2647_s1 + $0x80] sm:$0xff]  ;;  %v54_v35 = vld [vmem:[%s2646_s0 + $0x10] sm:$0xff]  ;;  %v59_v36 = vpack.c.bf16 %v52_v30, %v52_v30 }
  0x19   :  { %510 = vmatpush.bf16.msra.mxu3 %v1829_v23  ;;  %v60_v37 = vpack.c.bf16 %v53_v31, %v53_v31  ;;  %v1827_v38 = vld [vmem:[%s2647_s1 + $0xc0] sm:$0xff]  ;;  %v55_v40 = vld [vmem:[%s2646_s0 + $0x18] sm:$0xff]  ;;  %v1841_v41 = vld [vmem:[%s2647_s1 + $0x130] sm:$0xff]  ;;  %v61_v43 = vpack.c.bf16 %v54_v35, %v54_v35 }
  0x1a   :  { %472 = vmatpush.bf16.msra.mxu0 %v1804_v24  ;;  %v1851_v39 = vld [vmem:[%s2647_s1 + $0x180] sm:$0xff]  ;;  %v1849_v42 = vld [vmem:[%s2647_s1 + $0x170] sm:$0xff]  ;;  %v62_v44 = vpack.c.bf16 %v55_v40, %v55_v40  ;;  %v1840_v45 = vld [vmem:[%s2647_s1 + $0x128] sm:$0xff] }
  0x1b   :  { %485 = vmatpush.bf16.msra.mxu1 %v1812_v25  ;;  %v1848_v46 = vld [vmem:[%s2647_s1 + $0x168] sm:$0xff]  ;;  %v1839_v47 = vld [vmem:[%s2647_s1 + $0x120] sm:$0xff]  ;;  %v1838_v49 = vld [vmem:[%s2647_s1 + $0x118] sm:$0xff] }
  0x1c   :  { %498 = vmatpush.bf16.msra.mxu2 %v1820_v26  ;;  %v1847_v48 = vld [vmem:[%s2647_s1 + $0x160] sm:$0xff]  ;;  %v1846_v50 = vld [vmem:[%s2647_s1 + $0x158] sm:$0xff]  ;;  %v58_v51 = vld [vmem:[%s2646_s0 + $0x30] sm:$0xff] }
  0x1d   :  { %511 = vmatpush.bf16.msra.mxu3 %v1828_v28  ;;  %v1837_v52 = vld [vmem:[%s2647_s1 + $0x110] sm:$0xff]  ;;  %v65_v54 = vpack.c.bf16 %v58_v51, %v58_v51  ;;  %v1836_v55 = vld [vmem:[%s2647_s1 + $0x108] sm:$0xff]  ;;  %v1835_v57 = vld [vmem:[%s2647_s1 + $0x100] sm:$0xff] }
  0x1e   :  { %473 = vmatpush.bf16.msra.mxu0 %v1803_v27  ;;  %v1845_v53 = vld [vmem:[%s2647_s1 + $0x150] sm:$0xff]  ;;  %v1844_v56 = vld [vmem:[%s2647_s1 + $0x148] sm:$0xff]  ;;  %v1843_v58 = vld [vmem:[%s2647_s1 + $0x140] sm:$0xff] }
  0x1f   :  { %486 = vmatpush.bf16.msra.mxu1 %v1811_v29  ;;  %v56_v59 = vld [vmem:[%s2646_s0 + $0x20] sm:$0xff]  ;;  %v57_v60 = vld [vmem:[%s2646_s0 + $0x28] sm:$0xff]  ;;  %v1859_v63 = vld [vmem:[%s2649_s3 + $0x38] sm:$0xff] }
  0x20   :  { %499 = vmatpush.bf16.msra.mxu2 %v1819_v34  ;;  %v63_v61 = vpack.c.bf16 %v56_v59, %v56_v59  ;;  %v64_v62 = vpack.c.bf16 %v57_v60, %v57_v60  ;;  %v1858_v0 = vld [vmem:[%s2649_s3 + $0x30] sm:$0xff]  ;;  %v1857_v1 = vld [vmem:[%s2649_s3 + $0x28] sm:$0xff]  ;;  %v1856_v2 = vld [vmem:[%s2649_s3 + $0x20] sm:$0xff] }
  0x21   :  { %474 = vmatmul.bf16.vlgmr.msra.gmra.mxu0 %v59_v36  ;;  %512 = vmatpush.bf16.msra.mxu3 %v1827_v38  ;;  %v1855_v3 = vld [vmem:[%s2649_s3 + $0x18] sm:$0xff]  ;;  %v1854_v4 = vld [vmem:[%s2649_s3 + $0x10] sm:$0xff]  ;;  %v1853_v5 = vld [vmem:[%s2649_s3 + $0x8] sm:$0xff] }
  0x22   :  { %518 = vmatpush.bf16.msrb.mxu0 %v1842_v32  ;;  %487 = vmatmul.bf16.vlgmr.msra.gmra.mxu1 %v60_v37  ;;  %v1852_v8 = vld [vmem:[%s2649_s3] sm:$0xff]  ;;  %v1863_v11 = vld [vmem:[%s2651_s5 + $0x18] sm:$0xff]  ;;  %v1862_v14 = vld [vmem:[%s2651_s5 + $0x10] sm:$0xff] }
  0x23   :  { %531 = vmatpush.bf16.msrb.mxu1 %v1850_v33  ;;  %500 = vmatmul.bf16.vlgmr.msra.gmra.mxu2 %v61_v43  ;;  %v1927_v15 = vld [vmem:[%s2648_s2] ss:$0 sm:$0xff]  ;;  %v1861_v16 = vld [vmem:[%s2651_s5 + $0x8] sm:$0xff]  ;;  %v1864_v36 = vld [vmem:[%s2653_s7] sm:$0x30] }
  0x24   :  { %551 = vmatpush.bf16.msrb.mxu2 %v1851_v39  ;;  %513 = vmatmul.bf16.vlgmr.msra.gmra.mxu3 %v62_v44  ;;  %v1860_v34 = vld [vmem:[%s2651_s5] sm:$0xff] }
  0x25   :  { %627 = vmatpush.bf16.msrb.mxu3 %v1859_v63  ;;  %v1554_v35 = vld [vmem:[%s2653_s7] sm:$0xf] }
  0x26   :  { %519 = vmatpush.bf16.msrb.mxu0 %v1841_v41  ;;  %v1555_v37 = vor.u32 %v1864_v36, %v1554_v35  ;;  %v1928_v39 = vld [vmem:[%s2650_s4] ss:$0 sm:$0xff]  ;;  %v1902_v35 = vld [vmem:[%s2659_s13 + $0x100] sm:$0xf0] }
  0x27   :  { %532 = vmatpush.bf16.msrb.mxu1 %v1849_v42 }
  0x28   :  { %686 = vmatpush.bf16.msra.mxu2 %v1863_v11  ;;  %v714_v38 = vsel %vm712_vm1, %v1555_v37, 0  ;;  %v1915_v11 = vld [vmem:[%s2659_s13 + $0x168] sm:$0xf0]  ;;  %v1913_v37 = vld [vmem:[%s2659_s13 + $0x15c] sm:$0xf] }
  0x29   :  { %628 = vmatpush.bf16.msrb.mxu3 %v1858_v0  ;;  %v1866_v0 = vld [vmem:[%s2657_s11] sm:$0xff] }
  0x2a   :  { %520 = vmatpush.bf16.msrb.mxu0 %v1840_v45  ;;  %v1559_v45 = vld [vmem:[%s2655_s9] sm:$0xf] }
  0x2b   :  { %533 = vmatpush.bf16.msrb.mxu1 %v1848_v46  ;;  %v1865_v46 = vld [vmem:[%s2655_s9] sm:$0x30] }
  0x2c   :  { %687 = vmatpush.bf16.msra.mxu2 %v1862_v14  ;;  %v1751_v14 = vld [vmem:[%s2659_s13 + $0x16c] sm:$0xf0] }
  0x2d   :  { %629 = vmatpush.bf16.msrb.mxu3 %v1857_v1  ;;  %v1777_v1 = vld [vmem:[%s2659_s13 + $0x188] sm:$0xf] }
  0x2e   :  { %521 = vmatpush.bf16.msrb.mxu0 %v1839_v47  ;;  %v1560_v47 = vor.u32 %v1865_v46, %v1559_v45  ;;  %v1667_v45 = vld [vmem:[%s2659_s13 + $0xc4] sm:$0xf0]  ;;  %v1673_v46 = vld [vmem:[%s2659_s13 + $0xb0] sm:$0xf] }
  0x2f   :  { %534 = vmatpush.bf16.msrb.mxu1 %v1847_v48 }
  0x30   :  { %688 = vmatpush.bf16.msra.mxu2 %v1861_v16  ;;  %v746_v48 = vsel %vm712_vm1, %v1560_v47, 0  ;;  %v1916_v16 = vld [vmem:[%s2659_s13 + $0x170] sm:$0xf0] }
  0x31   :  { %630 = vmatpush.bf16.msrb.mxu3 %v1856_v2  ;;  %v1922_v2 = vld [vmem:[%s2659_s13 + $0x1a0] sm:$0xf0] }
  0x32   :  { %522 = vmatpush.bf16.msrb.mxu0 %v1838_v49  ;;  %v1929_v49 = vld [vmem:[%s2652_s6] ss:$0 sm:$0xff] }
  0x33   :  { %535 = vmatpush.bf16.msrb.mxu1 %v1846_v50  ;;  %1502 = vmatmul.msk.bf16.vlgmr.msrb.gmra.mxu2 %vm462_vm0, %v65_v54 }
  0x34   :  { %689 = vmatpush.bf16.msra.mxu2 %v1860_v34  ;;  %v1701_v34 = vld [vmem:[%s2659_s13 + $0xe8] sm:$0xf] }
  0x35   :  { %631 = vmatpush.bf16.msrb.mxu3 %v1855_v3  ;;  %v1919_v3 = vld [vmem:[%s2659_s13 + $0x18c] sm:$0xf] }
  0x36   :  { %523 = vmatpush.bf16.msrb.mxu0 %v1837_v52 }
  0x37   :  { %536 = vmatpush.bf16.msrb.mxu1 %v1845_v53 }
  0x38   :  { %723 = vmatpush.bf16.msrb.mxu2 %v714_v38 }
  0x39   :  { %632 = vmatpush.bf16.msrb.mxu3 %v1854_v4  ;;  %v1778_v4 = vor.u32 %v1922_v2, %v1777_v1  ;;  %v1609_v1 = vld [vmem:[%s2659_s13 + $0x38] sm:$0xf]  ;;  %v1880_v2 = vld [vmem:[%s2659_s13 + $0x50] sm:$0xf0] }
  0x3a   :  { %524 = vmatpush.bf16.msrb.mxu0 %v1836_v55  ;;  %v1869_v55 = vld [vmem:[%s2657_s11 + $0x18] sm:$0xff] }
  0x3b   :  { %537 = vmatpush.bf16.msrb.mxu1 %v1844_v56  ;;  %v1868_v56 = vld [vmem:[%s2657_s11 + $0x10] sm:$0xff] }
  0x3d   :  { %633 = vmatpush.bf16.msrb.mxu3 %v1853_v5  ;;  %v1779_v5 = vld [vmem:[%s2659_s13 + $0x1a4] sm:$0xf0] }
  0x3e   :  { %525 = vmatpush.bf16.msrb.mxu0 %v1835_v57  ;;  %v1867_v57 = vld [vmem:[%s2657_s11 + $0x8] sm:$0xff] }
  0x3f   :  { %538 = vmatpush.bf16.msrb.mxu1 %v1843_v58  ;;  %v1930_v58 = vld [vmem:[%s2654_s8] ss:$0 sm:$0xff] }
  0x41   :  { %526 = vmatmul.bf16.vlgmr.msrb.gmra.mxu0 %v63_v61  ;;  %634 = vmatpush.bf16.msrb.mxu3 %v1852_v8  ;;  %v1782_v8 = vor.u32 %v1919_v3, %v1779_v5 }
  0x42   :  { %539 = vmatmul.bf16.vlgmr.msrb.gmra.mxu1 %v64_v62 }
  0x43   :  { %755 = vmatpush.bf16.msra.mxu1 %v746_v48  ;;  %1198 = vmatpush.bf16.msra.mxu0 %v1782_v8  ;;  %v1895_v48 = vld [vmem:[%s2659_s13 + $0xc8] sm:$0xf0]  ;;  %v1675_v8 = vld [vmem:[%s2659_s13 + $0xcc] sm:$0xf0] }
  0x45   :  { %1185 = vmatpush.bf16.msra.mxu3 %v1778_v4 }
  0x9e   :  { %v475_v6 = vpop.f32.mrf.mxu0 }
  0x9f   :  { %v488_v7 = vpop.f32.mrf.mxu1  ;;  %v476_v17 = vadd.f32 %v1927_v15, %v475_v6  ;;  %v1785_v6 = vld [vmem:[%s2659_s13 + $0x190] sm:$0xf]  ;;  %v1757_v15 = vld [vmem:[%s2659_s13 + $0x158] sm:$0xf] }
  0xa1   :  { %v489_v20 = vadd.f32 %v488_v7, %v476_v17  ;;  %v1923_v7 = vld [vmem:[%s2659_s13 + $0x1a8] sm:$0xf0] }
  0xa6   :  { %v477_v9 = vpop.f32.mrf.mxu0  ;;  %v501_v12 = vpop.f32.mrf.mxu2 }
  0xa7   :  { %v490_v10 = vpop.f32.mrf.mxu1  ;;  %v514_v13 = vpop.f32.mrf.mxu3  ;;  %v502_v21 = vadd.f32 %v501_v12, %v489_v20  ;;  %v1786_v9 = vor.u32 %v1923_v7, %v1785_v6  ;;  %v1912_v12 = vld [vmem:[%s2659_s13 + $0x154] sm:$0xf]  ;;  %v1877_v6 = vld [vmem:[%s2659_s13 + $0x3c] sm:$0xf] }
  0xa8   :  { %v1749_v10 = vld [vmem:[%s2659_s13 + $0x150] sm:$0xf]  ;;  %v1754_v17 = vor.u32 %v1912_v12, %v1751_v14  ;;  %v1908_v20 = vld [vmem:[%s2659_s13 + $0x130] sm:$0xf0]  ;;  %v1610_v12 = vor.u32 %v1880_v2, %v1609_v1  ;;  %v1873_v14 = vld [vmem:[%s2659_s13 + $0x18] sm:$0xf0] }
  0xa9   :  { %v515_v23 = vadd.f32 %v514_v13, %v502_v21  ;;  %v1750_v13 = vor.u32 %v1915_v11, %v1749_v10  ;;  %1211 = vmatpush.bf16.msrb.mxu1 %v1786_v9  ;;  %v1905_v21 = vld [vmem:[%s2659_s13 + $0x11c] sm:$0xf]  ;;  %v1892_v7 = vld [vmem:[%s2659_s13 + $0xb4] sm:$0xf]  ;;  %v1611_v9 = vld [vmem:[%s2659_s13 + $0x54] sm:$0xf0] }
  0xaa   :  { %1199 = vmatpush.bf16.msra.mxu0 %v1754_v17  ;;  %v1617_v10 = vld [vmem:[%s2659_s13 + $0x40] sm:$0xf]  ;;  %v1881_v11 = vld [vmem:[%s2659_s13 + $0x58] sm:$0xf0]  ;;  %v1709_v1 = vld [vmem:[%s2659_s13 + $0xf0] sm:$0xf] }
  0xab   :  { %1186 = vmatpush.bf16.msra.mxu3 %v1750_v13  ;;  %v1581_v13 = vld [vmem:[%s2659_s13] sm:$0xf] }
  0xae   :  { %v503_v18 = vpop.f32.mrf.mxu2 }
  0xaf   :  { %v516_v19 = vpop.f32.mrf.mxu3  ;;  %v1758_v18 = vor.u32 %v1916_v16, %v1757_v15  ;;  %v1870_v15 = vld [vmem:[%s2659_s13 + $0x4] sm:$0xf]  ;;  %v1678_v16 = vor.u32 %v1892_v7, %v1675_v8  ;;  %v1717_v8 = vld [vmem:[%s2659_s13 + $0xf8] sm:$0xf] }
  0xb0   :  { %v1721_v19 = vld [vmem:[%s2659_s13 + $0x118] sm:$0xf] }
  0xb1   :  { %1212 = vmatpush.bf16.msrb.mxu1 %v1758_v18  ;;  %v1614_v18 = vor.u32 %v1877_v6, %v1611_v9  ;;  %v1904_v9 = vld [vmem:[%s2659_s13 + $0x110] sm:$0xf0] }
  0xb6   :  { %v553_v22 = vpop.f32.mrf.mxu2 }
  0xbe   :  { %v527_v24 = vpop.f32.mrf.mxu0  ;;  %v555_v28 = vpop.f32.mrf.mxu2 }
  0xbf   :  { %v540_v25 = vpop.f32.mrf.mxu1  ;;  %v528_v26 = vadd.f32 %v527_v24, %v515_v23  ;;  %v1729_v23 = vld [vmem:[%s2659_s13 + $0x120] sm:$0xf]  ;;  %v1909_v24 = vld [vmem:[%s2659_s13 + $0x138] sm:$0xf0] }
  0xc1   :  { %v541_v27 = vadd.f32 %v540_v25, %v528_v26  ;;  %v1722_v25 = vor.u32 %v1908_v20, %v1721_v19  ;;  %v1693_v26 = vld [vmem:[%s2659_s13 + $0xe0] sm:$0xf]  ;;  %v1618_v19 = vor.u32 %v1881_v11, %v1617_v10  ;;  %v1718_v10 = vor.u32 %v1904_v9, %v1717_v8  ;;  %v1681_v11 = vld [vmem:[%s2659_s13 + $0xb8] sm:$0xf] }
  0xc2   :  { %v1583_v20 = vld [vmem:[%s2659_s13 + $0x1c] sm:$0xf0] }
  0xc3   :  { %v554_v29 = vadd.f32 %v553_v22, %v541_v27  ;;  %v1723_v22 = vld [vmem:[%s2659_s13 + $0x134] sm:$0xf0]  ;;  %v1901_v27 = vld [vmem:[%s2659_s13 + $0xf8] sm:$0xf0]  ;;  %1187 = vmatpush.bf16.msra.mxu3 %v1722_v25  ;;  %v1924_v25 = vld [vmem:[%s2659_s13 + $0x1b0] sm:$0xf0] }
  0xc4   :  { %v1726_v28 = vor.u32 %v1905_v21, %v1723_v22  ;;  %v1694_v38 = vor.u32 %v1901_v27, %v1693_v26  ;;  %v1589_v21 = vld [vmem:[%s2659_s13 + $0x8] sm:$0xf]  ;;  %v1874_v22 = vld [vmem:[%s2659_s13 + $0x20] sm:$0xf0]  ;;  %v1921_v26 = vld [vmem:[%s2659_s13 + $0x19c] sm:$0xf] }
  0xc5   :  { %v557_v30 = vmax.f32 %v554_v29, 0.0  ;;  %v1730_v29 = vor.u32 %v1909_v24, %v1729_v23  ;;  %v1793_v24 = vld [vmem:[%s2659_s13 + $0x198] sm:$0xf] }
  0xc6   :  { %v529_v31 = vpop.f32.mrf.mxu0  ;;  %1200 = vmatpush.bf16.msra.mxu0 %v1726_v28  ;;  %v1795_v27 = vld [vmem:[%s2659_s13 + $0x1b4] sm:$0xf0]  ;;  %v1801_v28 = vld [vmem:[%s2659_s13 + $0x1a0] sm:$0xf] }
  0xc7   :  { %v542_v32 = vpop.f32.mrf.mxu1  ;;  %v558_v33 = vpack.c.bf16 %v557_v30, %v557_v30  ;;  %v1898_v30 = vld [vmem:[%s2659_s13 + $0xe4] sm:$0xf]  ;;  %v1920_v31 = vld [vmem:[%s2659_s13 + $0x194] sm:$0xf]  ;;  %1213 = vmatpush.bf16.msrb.mxu1 %v1730_v29  ;;  %1188 = vmatpush.bf16.msra.mxu3 %v1694_v38  ;;  %v1925_v29 = vld [vmem:[%s2659_s13 + $0x1b8] sm:$0xf0]  ;;  %v1798_v38 = vor.u32 %v1921_v26, %v1795_v27 }
  0xc8   :  { %v1787_v32 = vld [vmem:[%s2659_s13 + $0x1ac] sm:$0xf0]  ;;  %v1890_v26 = vld [vmem:[%s2659_s13 + $0xa0] sm:$0xf0] }
  0xc9   :  { %635 = vmatmul.bf16.vlgmr.msrb.gmra.mxu3 %v558_v33  ;;  %v1695_v33 = vld [vmem:[%s2659_s13 + $0xfc] sm:$0xf0]  ;;  %v1790_v36 = vor.u32 %v1920_v31, %v1787_v32  ;;  %v1582_v31 = vor.u32 %v1873_v14, %v1581_v13  ;;  %v1885_v32 = vld [vmem:[%s2659_s13 + $0x7c] sm:$0xf] }
  0xca   :  { %v1893_v13 = vld [vmem:[%s2659_s13 + $0xbc] sm:$0xf] }
 0x14c   :  { %v636_v40 = vpop.f32.mrf.mxu3 }
 0x14d   :  { %v637_v41 = vadd.f32 %v1928_v39, %v636_v40  ;;  %v1665_v39 = vld [vmem:[%s2659_s13 + $0xa8] sm:$0xf]  ;;  %v1894_v40 = vld [vmem:[%s2659_s13 + $0xc0] sm:$0xf0] }
 0x14f   :  { %v640_v42 = vmax.f32 %v637_v41, 0.0  ;;  %v1759_v41 = vld [vmem:[%s2659_s13 + $0x174] sm:$0xf0] }
 0x150   :  { %v1762_v47 = vor.u32 %v1913_v37, %v1759_v41  ;;  %v1794_v37 = vor.u32 %v1924_v25, %v1793_v24  ;;  %v1655_v24 = vld [vmem:[%s2659_s13 + $0x9c] sm:$0xf0]  ;;  %v1661_v25 = vld [vmem:[%s2659_s13 + $0x88] sm:$0xf] }
 0x151   :  { %v641_v43 = vpack.c.bf16 %v640_v42, %v640_v42  ;;  %v1698_v42 = vor.u32 %v1898_v30, %v1695_v33  ;;  %v1647_v33 = vld [vmem:[%s2659_s13 + $0x94] sm:$0xf0] }
 0x152   :  { %v1650_v41 = vor.u32 %v1885_v32, %v1647_v33  ;;  %v1627_v32 = vld [vmem:[%s2659_s13 + $0x64] sm:$0xf0]  ;;  %v1633_v33 = vld [vmem:[%s2659_s13 + $0x50] sm:$0xf] }
 0x153   :  { %1551 = vmatmul.msk.bf16.vlgmr.msra.gmra.mxu2 %vm678_vm2, %v641_v43  ;;  %v1702_v43 = vor.u32 %v1902_v35, %v1701_v34  ;;  %1201 = vmatpush.bf16.msra.mxu0 %v1698_v42  ;;  %v1586_v34 = vor.u32 %v1870_v15, %v1583_v20  ;;  %v1590_v35 = vor.u32 %v1874_v22, %v1589_v21  ;;  %v1917_v42 = vld [vmem:[%s2659_s13 + $0x178] sm:$0xf0]  ;;  %v1683_v15 = vld [vmem:[%s2659_s13 + $0xd4] sm:$0xf0]  ;;  %v1653_v20 = vld [vmem:[%s2659_s13 + $0x80] sm:$0xf] }
 0x154   :  { %v638_v44 = vpop.f32.mrf.mxu3  ;;  %806 = vmatpush.bf16.msra.mxu2 %v1869_v55  ;;  %v1889_v21 = vld [vmem:[%s2659_s13 + $0x98] sm:$0xf0]  ;;  %v1886_v22 = vld [vmem:[%s2659_s13 + $0x84] sm:$0xf] }
 0x155   :  { %v1891_v44 = vld [vmem:[%s2659_s13 + $0xac] sm:$0xf]  ;;  %1214 = vmatpush.bf16.msrb.mxu1 %v1702_v43  ;;  %v1914_v43 = vld [vmem:[%s2659_s13 + $0x164] sm:$0xf]  ;;  %v1658_v27 = vor.u32 %v1886_v22, %v1655_v24 }
 0x156   :  { %v1670_v55 = vor.u32 %v1891_v44, %v1667_v45  ;;  %v1767_v44 = vld [vmem:[%s2659_s13 + $0x17c] sm:$0xf0]  ;;  %v1773_v45 = vld [vmem:[%s2659_s13 + $0x168] sm:$0xf] }
 0x158   :  { %807 = vmatpush.bf16.msra.mxu2 %v1868_v56  ;;  %v1674_v56 = vor.u32 %v1895_v48, %v1673_v46  ;;  %1202 = vmatpush.bf16.msra.mxu0 %v1670_v55  ;;  %v1918_v46 = vld [vmem:[%s2659_s13 + $0x180] sm:$0xf0] }
 0x159   :  { %v1910_v55 = vld [vmem:[%s2659_s13 + $0x140] sm:$0xf0] }
 0x15a   :  { %1215 = vmatpush.bf16.msrb.mxu1 %v1674_v56  ;;  %v1907_v56 = vld [vmem:[%s2659_s13 + $0x12c] sm:$0xf] }
 0x15c   :  { %808 = vmatpush.bf16.msra.mxu2 %v1867_v57  ;;  %v1884_v57 = vld [vmem:[%s2659_s13 + $0x74] sm:$0xf] }
 0x160   :  { %809 = vmatpush.bf16.msra.mxu2 %v1866_v0 }
 0x1d6   :  { %v691_v50 = vpop.f32.mrf.mxu2 }
 0x1d7   :  { %v692_v51 = vadd.f32 %v1929_v49, %v691_v50  ;;  %v1906_v49 = vld [vmem:[%s2659_s13 + $0x124] sm:$0xf]  ;;  %v1731_v50 = vld [vmem:[%s2659_s13 + $0x13c] sm:$0xf0] }
 0x1d9   :  { %v695_v52 = vmax.f32 %v692_v51, 0.0  ;;  %v1666_v51 = vor.u32 %v1894_v40, %v1665_v39  ;;  %v1765_v39 = vld [vmem:[%s2659_s13 + $0x160] sm:$0xf]  ;;  %v1802_v40 = vor.u32 %v1925_v29, %v1801_v28  ;;  %v1662_v28 = vor.u32 %v1890_v26, %v1661_v25  ;;  %v1625_v29 = vld [vmem:[%s2659_s13 + $0x48] sm:$0xf] }
 0x1da   :  { %v1766_v48 = vor.u32 %v1917_v42, %v1765_v39  ;;  %v1875_v39 = vld [vmem:[%s2659_s13 + $0x28] sm:$0xf0]  ;;  %v1605_v42 = vld [vmem:[%s2659_s13 + $0x18] sm:$0xf] }
 0x1db   :  { %v696_v53 = vpack.c.bf16 %v695_v52, %v695_v52  ;;  %v1637_v52 = vld [vmem:[%s2659_s13 + $0x70] sm:$0xf]  ;;  %1189 = vmatpush.bf16.msra.mxu3 %v1666_v51  ;;  %v1878_v51 = vld [vmem:[%s2659_s13 + $0x44] sm:$0xf] }
 0x1dd   :  { %1556 = vmatmul.msk.bf16.vlgmr.msrb.gmra.mxu2 %vm708_vm3, %v696_v53  ;;  %v1887_v53 = vld [vmem:[%s2659_s13 + $0x88] sm:$0xf0] }
 0x1de   :  { %v693_v54 = vpop.f32.mrf.mxu2  ;;  %1224 = vmatpush.bf16.msrb.mxu2 %v1790_v36  ;;  %v1638_v0 = vor.u32 %v1887_v53, %v1637_v52  ;;  %v1619_v52 = vld [vmem:[%s2659_s13 + $0x5c] sm:$0xf0]  ;;  %v1737_v53 = vld [vmem:[%s2659_s13 + $0x128] sm:$0xf] }
 0x1df   :  { %v1734_v54 = vor.u32 %v1906_v49, %v1731_v50  ;;  %v1770_v49 = vor.u32 %v1914_v43, %v1767_v44  ;;  %v1774_v50 = vor.u32 %v1918_v46, %v1773_v45  ;;  %v1876_v43 = vld [vmem:[%s2659_s13 + $0x30] sm:$0xf0] }
 0x1e0   :  { %1190 = vmatpush.bf16.msra.mxu3 %v1638_v0  ;;  %v1591_v0 = vld [vmem:[%s2659_s13 + $0x24] sm:$0xf0]  ;;  %v1606_v46 = vor.u32 %v1876_v43, %v1605_v42 }
 0x1e2   :  { %1225 = vmatpush.bf16.msrb.mxu2 %v1762_v47 }
 0x1e4   :  { %1191 = vmatpush.bf16.msra.mxu3 %v1610_v12  ;;  %v1896_v12 = vld [vmem:[%s2659_s13 + $0xd0] sm:$0xf0] }
 0x1e5   :  { %v1682_v14 = vor.u32 %v1896_v12, %v1681_v11 }
 0x1e6   :  { %1226 = vmatpush.bf16.msrb.mxu2 %v1734_v54  ;;  %v1622_v54 = vor.u32 %v1878_v51, %v1619_v52 }
 0x1e8   :  { %1192 = vmatpush.bf16.msra.mxu3 %v1582_v31  ;;  %v1879_v31 = vld [vmem:[%s2659_s13 + $0x4c] sm:$0xf] }
 0x1ec   :  { %1237 = vmatpush.bf16.msrb.mxu3 %v1794_v37 }
 0x1f0   :  { %1238 = vmatpush.bf16.msrb.mxu3 %v1766_v48 }
 0x260   :  { %v725_v59 = vpop.f32.mrf.mxu2 }
 0x261   :  { %v726_v60 = vadd.f32 %v1930_v58, %v725_v59  ;;  %v1899_v58 = vld [vmem:[%s2659_s13 + $0xec] sm:$0xf]  ;;  %v1703_v59 = vld [vmem:[%s2659_s13 + $0x104] sm:$0xf0] }
 0x262   :  { %v1706_v3 = vor.u32 %v1899_v58, %v1703_v59  ;;  %v1738_v58 = vor.u32 %v1910_v55, %v1737_v53  ;;  %v881_v53 = vld [vmem:[%s2660_s14] sm:$0x7f] }
 0x263   :  { %v729_v61 = vmax.f32 %v726_v60, 0.0  ;;  %v1639_v60 = vld [vmem:[%s2659_s13 + $0x8c] sm:$0xf0]  ;;  %v885_v55 = vperm.slane %v881_v53, 2  ;;  %v889_v8 = vperm.slane %v881_v53, 6 }
 0x264   :  { %v1642_v4 = vor.u32 %v1884_v57, %v1639_v60  ;;  %1227 = vmatpush.bf16.msrb.mxu2 %v1706_v3  ;;  %v1739_v57 = vld [vmem:[%s2659_s13 + $0x144] sm:$0xf0]  ;;  %v1745_v60 = vld [vmem:[%s2659_s13 + $0x130] sm:$0xf]  ;;  %1239 = vmatpush.bf16.msrb.mxu3 %v1738_v58  ;;  %v1903_v3 = vld [vmem:[%s2659_s13 + $0x108] sm:$0xf0] }
 0x265   :  { %v730_v62 = vpack.c.bf16 %v729_v61, %v729_v61  ;;  %v1645_v61 = vld [vmem:[%s2659_s13 + $0x78] sm:$0xf]  ;;  %v1742_v59 = vor.u32 %v1907_v56, %v1739_v57  ;;  %v1710_v6 = vor.u32 %v1903_v3, %v1709_v1 }
 0x266   :  { %1203 = vmatpush.bf16.msra.mxu0 %v1642_v4  ;;  %v1900_v4 = vld [vmem:[%s2659_s13 + $0xf4] sm:$0xf] }
 0x267   :  { %1561 = vmatmul.msk.bf16.vlgmr.msra.gmra.mxu1 %vm708_vm3, %v730_v62  ;;  %v1888_v62 = vld [vmem:[%s2659_s13 + $0x90] sm:$0xf0] }
 0x268   :  { %v727_v63 = vpop.f32.mrf.mxu2  ;;  %v1646_v5 = vor.u32 %v1888_v62, %v1645_v61  ;;  %1228 = vmatpush.bf16.msrb.mxu2 %v1678_v16  ;;  %v1911_v61 = vld [vmem:[%s2659_s13 + $0x148] sm:$0xf0]  ;;  %1240 = vmatpush.bf16.msrb.mxu3 %v1710_v6  ;;  %v1689_v16 = vld [vmem:[%s2659_s13 + $0xc0] sm:$0xf]  ;;  %v888_v6 = vperm.slane %v881_v53, 5 }
 0x269   :  { %v1931_v63 = vld [vmem:[%s2656_s10] ss:$0 sm:$0xff]  ;;  %v1746_v62 = vor.u32 %v1911_v61, %v1745_v60  ;;  %v883_v60 = vperm.slane %v881_v53, 0  ;;  %v886_v61 = vperm.slane %v881_v53, 3  ;;  %s1297_s10 = sshll.u32 %s2661_s15, 4  ;;  %s1298_s10 = int_to_ptr.hbm [resolvable:$true] %s1297_s10 }
 0x26a   :  { %1216 = vmatpush.bf16.msrb.mxu1 %v1646_v5  ;;  %1204 = vmatpush.bf16.msra.mxu0 %v1614_v18  ;;  %v1711_v5 = vld [vmem:[%s2659_s13 + $0x10c] sm:$0xf0]  ;;  %v1686_v18 = vor.u32 %v1893_v13, %v1683_v15 }
 0x26b   :  { %v1714_v7 = vor.u32 %v1900_v4, %v1711_v5 }
 0x26c   :  { %1229 = vmatpush.bf16.msrb.mxu2 %v1650_v41  ;;  %1241 = vmatpush.bf16.msrb.mxu3 %v1682_v14  ;;  %v1599_v41 = vld [vmem:[%s2659_s13 + $0x2c] sm:$0xf0] }
 0x26e   :  { %1217 = vmatpush.bf16.msrb.mxu1 %v1618_v19  ;;  %1205 = vmatpush.bf16.msra.mxu0 %v1586_v34  ;;  %v1883_v34 = vld [vmem:[%s2659_s13 + $0x68] sm:$0xf0] }
 0x26f   :  { %v1634_v37 = vor.u32 %v1883_v34, %v1633_v33 }
 0x270   :  { %1230 = vmatpush.bf16.msrb.mxu2 %v1622_v54  ;;  %v884_v54 = vperm.slane %v881_v53, 1 }
 0x272   :  { %1218 = vmatpush.bf16.msrb.mxu1 %v1590_v35  ;;  %1250 = vmatpush.bf16.msrb.mxu0 %v1798_v38  ;;  %v1597_v38 = vld [vmem:[%s2659_s13 + $0x10] sm:$0xf] }
 0x273   :  { %v1598_v44 = vor.u32 %v1875_v39, %v1597_v38 }
 0x276   :  { %1263 = vmatpush.bf16.msra.mxu1 %v1802_v40  ;;  %1251 = vmatpush.bf16.msrb.mxu0 %v1770_v49  ;;  %v1872_v40 = vld [vmem:[%s2659_s13 + $0x14] sm:$0xf] }
 0x277   :  { %v1602_v45 = vor.u32 %v1872_v40, %v1599_v41 }
 0x27a   :  { %1264 = vmatpush.bf16.msra.mxu1 %v1774_v50  ;;  %1252 = vmatpush.bf16.msrb.mxu0 %v1742_v59 }
 0x27e   :  { %1265 = vmatpush.bf16.msra.mxu1 %v1746_v62  ;;  %1253 = vmatpush.bf16.msrb.mxu0 %v1714_v7 }
 0x282   :  { %1266 = vmatpush.bf16.msra.mxu1 %v1718_v10  ;;  %1254 = vmatpush.bf16.msrb.mxu0 %v1686_v18 }
 0x286   :  { %1255 = vmatpush.bf16.msrb.mxu0 %v1658_v27 }
 0x2e4   :  { %v757_v17 = vpop.f32.mrf.mxu1 }
 0x2e5   :  { %v758_v23 = vadd.f32 %v1931_v63, %v757_v17  ;;  %v1871_v63 = vld [vmem:[%s2659_s13 + $0xc] sm:$0xf]  ;;  %v1897_v17 = vld [vmem:[%s2659_s13 + $0xd8] sm:$0xf0] }
 0x2e6   :  { %v1594_v2 = vor.u32 %v1871_v63, %v1591_v0  ;;  %v1690_v19 = vor.u32 %v1897_v17, %v1689_v16  ;;  %v887_v16 = vperm.slane %v881_v53, 4 }
 0x2e7   :  { %v761_v30 = vmax.f32 %v758_v23, 0.0  ;;  %v1654_v23 = vor.u32 %v1889_v21, %v1653_v20 }
 0x2e8   :  { %1231 = vmatpush.bf16.msrb.mxu2 %v1594_v2  ;;  %1267 = vmatpush.bf16.msra.mxu1 %v1690_v19 }
 0x2e9   :  { %v762_v36 = vpack.c.bf16 %v761_v30, %v761_v30  ;;  %v1882_v30 = vld [vmem:[%s2659_s13 + $0x60] sm:$0xf0]  ;;  %1242 = vmatpush.bf16.msrb.mxu3 %v1654_v23 }
 0x2ea   :  { %v1626_v35 = vor.u32 %v1882_v30, %v1625_v29 }
 0x2eb   :  { %1578 = vmatmul.msk.bf16.vlgmr.msra.gmra.mxu2 %vm678_vm2, %v762_v36  ;;  %v1630_v36 = vor.u32 %v1879_v31, %v1627_v32 }
 0x2ec   :  { %v759_v47 = vpop.f32.mrf.mxu1  ;;  %1268 = vmatpush.bf16.msra.mxu1 %v1662_v28 }
 0x2ed   :  { %1243 = vmatpush.bf16.msrb.mxu3 %v1626_v35  ;;  %1256 = vmatpush.bf16.msrb.mxu0 %v1630_v36  ;;  %v1932_v47 = vld [vmem:[%s2658_s12] ss:$0 sm:$0xff]  ;;  %s1973_s12 = smov [#allocation2]  }
 0x2ee   :  { %s1295_s14 = sshll.u32 %s1973_s12, 4  ;;  %s1296_s14 = int_to_ptr.vmem [resolvable:$true] %s1295_s14 }
 0x2f0   :  { %1269 = vmatpush.bf16.msra.mxu1 %v1634_v37 }
 0x2f1   :  { %1244 = vmatpush.bf16.msrb.mxu3 %v1598_v44  ;;  %1257 = vmatpush.bf16.msrb.mxu0 %v1602_v45 }
 0x2f4   :  { %1270 = vmatpush.bf16.msra.mxu1 %v1606_v46 }
 0x36e   :  { %v811_v48 = vpop.f32.mrf.mxu2 }
 0x36f   :  { %v812_v49 = vadd.f32 %v1932_v47, %v811_v48 }
 0x371   :  { %v815_v50 = vmax.f32 %v812_v49, 0.0 }
 0x373   :  { %v816_v51 = vpack.c.bf16 %v815_v50, %v815_v50 }
 0x375   :  { %1193 = vmatmul.bf16.vlgmr.msra.gmra.mxu3 %v816_v51  ;;  %1206 = vmatmul.bf16.vlgmr.msra.gmra.mxu0 %v816_v51 }
 0x376   :  { %1219 = vmatmul.bf16.vlgmr.msrb.gmra.mxu1 %v816_v51  ;;  %1232 = vmatmul.bf16.vlgmr.msrb.gmra.mxu2 %v816_v51  ;;  %v813_v52 = vpop.f32.mrf.mxu2 }
 0x385   :  { %1245 = vmatmul.bf16.vlgmr.msrb.gmra.mxu3 %v816_v51  ;;  %1258 = vmatmul.bf16.vlgmr.msrb.gmra.mxu0 %v816_v51 }
 0x386   :  { %1271 = vmatmul.bf16.vlgmr.msra.gmra.mxu1 %v816_v51 }
 0x3f2   :  { %v1207_v56 = vpop.f32.mrf.mxu0 }
 0x3f3   :  { %v1208_v57 = vadd.f32 %v1207_v56, %v884_v54  ;;  %v1220_v58 = vpop.f32.mrf.mxu1 }
 0x3f4   :  { %v1221_v59 = vadd.f32 %v1220_v58, %v885_v55 }
 0x3f5   :  { %1933 = vtanh.f32 %v1208_v57 }
 0x3f6   :  { %1935 = vtanh.f32 %v1221_v59 }
 0x3f8   :  { %v1194_v62 = vpop.f32.mrf.mxu3 }
 0x3f9   :  { %v1195_v63 = vadd.f32 %v1194_v62, %v883_v60  ;;  %v1233_v0 = vpop.f32.mrf.mxu2 }
 0x3fa   :  { %v1234_v1 = vadd.f32 %v1233_v0, %v886_v61  ;;  %v1209_v2 = vpop.f32.mrf.mxu0 }
 0x3fb   :  { %v1934_v3 = vpop.eup %1933  ;;  %1937 = vtanh.f32 %v1195_v63  ;;  %v1222_v4 = vpop.f32.mrf.mxu1 }
 0x3fc   :  { %v1936_v5 = vpop.eup %1935  ;;  %1284 = vst [vmem:[#allocation2 + $0x8] sm:$0xff] %v1934_v3  ;;  %1939 = vtanh.f32 %v1234_v1 }
 0x3fd   :  { %1285 = vst [vmem:[#allocation2 + $0x10] sm:$0xff] %v1936_v5 }
 0x400   :  { %v1196_v7 = vpop.f32.mrf.mxu3 }
 0x401   :  { %v1938_v9 = vpop.eup %1937  ;;  %v1235_v10 = vpop.f32.mrf.mxu2 }
 0x402   :  { %v1940_v11 = vpop.eup %1939  ;;  %1283 = vst [vmem:[#allocation2] sm:$0xff] %v1938_v9  ;;  %v1259_v12 = vpop.f32.mrf.mxu0 }
 0x403   :  { %1286 = vst [vmem:[#allocation2 + $0x18] sm:$0xff] %v1940_v11  ;;  %v1260_v13 = vadd.f32 %v1259_v12, %v888_v6  ;;  %v1272_v14 = vpop.f32.mrf.mxu1 }
 0x404   :  { %v1273_v15 = vadd.f32 %v1272_v14, %v889_v8 }
 0x405   :  { %1941 = vtanh.f32 %v1260_v13 }
 0x406   :  { %1943 = vtanh.f32 %v1273_v15 }
 0x408   :  { %v1246_v17 = vpop.f32.mrf.mxu3 }
 0x409   :  { %v1247_v18 = vadd.f32 %v1246_v17, %v887_v16 }
 0x40a   :  { %v1261_v19 = vpop.f32.mrf.mxu0 }
 0x40b   :  { %v1942_v20 = vpop.eup %1941  ;;  %1945 = vtanh.f32 %v1247_v18  ;;  %v1274_v21 = vpop.f32.mrf.mxu1 }
 0x40c   :  { %v1944_v22 = vpop.eup %1943  ;;  %1288 = vst [vmem:[#allocation2 + $0x28] sm:$0xff] %v1942_v20 }
 0x40d   :  { %1289 = vst.msk [vmem:[#allocation2 + $0x30] sm:$0xff] %vm462_vm0, %v1944_v22 }
 0x410   :  { %v1248_v23 = vpop.f32.mrf.mxu3 }
 0x411   :  { %v1946_v24 = vpop.eup %1945 }
 0x412   :  { %1287 = vst [vmem:[#allocation2 + $0x20] sm:$0xff] %v1946_v24 }
 0x413   :  { %1300 = dma.vmem_to_hbm [thread:$0]  %s1296_s14, 896, %s1298_s10, [#allocation3]  }
 0x414   :  { %1971 = dma.done.wait [#allocation3], 896  }
 0x415   :  { %1972 = vsyncadd [#allocation3], 4294966400 }
 0x416   :  { %1305 = vsyncpa [#allocation3], 1 }

</bundles_post_ra>
